<compile_context>
chip_gen: v6e
topology: v6e:2x2x1
jax: 0.10.0
libtpu: 0.0.40
codegen_flags: <defaults>
</compile_context>

<pallas_src>
import jax
import jax.numpy as jnp
from jax.experimental import pallas as pl
from jax.experimental.pallas import tpu as pltpu

G = 4  # number of graph branches (fixed by the module)


def attention_fusion_kernel(x_ref, w_ref, b_ref, a_ref, s_ref, o_ref):
    # x_ref : (TN, G*D_in)        bf16 packed inputs  [x0|x1|x2|x3]
    # w_ref : (G*D_in, G*D_out)   bf16 block-diagonal Linear weights
    # b_ref : (1, G*D_out)        f32 packed Linear biases
    # a_ref : (G*D_out, G*D_out)  bf16 merged score+broadcast matrix (block-diag, cols = aw)
    # s_ref : (G*D_out, D_out)    bf16 chunk-sum matrix, pre-scaled by d_out
    # o_ref : (TN, D_out)         f32 fused output

    # 1) One fused MXU matmul for all 4 branch Linear layers (f32 accumulation), bias + relu.
    h = jnp.dot(x_ref[...], w_ref[...], preferred_element_type=jnp.float32)
    h = jnp.maximum(h + b_ref[...], 0.0)                 # (TN, G*D_out) = [h0|h1|h2|h3]
    h_bf = h.astype(a_ref.dtype)                         # single narrow copy reused below

    # 2) Attention scores, already replicated across each d_out-wide lane chunk
    #    (A_bcast merges the old A and E constants -> no mask, one fewer MXU matmul).
    scores = jnp.dot(h_bf, a_ref[...], preferred_element_type=jnp.float32)   # (TN, G*D_out)

    # 3) Softmax over the graph axis.  Every score appears d_out times per chunk, so the
    #    lane-max equals the graph-max and the lane-sum equals d_out * graph-sum; the
    #    extra 1/d_out is folded (exactly) into s_ref.
    m = jnp.max(scores, axis=-1, keepdims=True)
    e = jnp.exp(scores - m)
    inv = pl.reciprocal(jnp.sum(e, axis=-1, keepdims=True), approx=True)     # EUP slot
    att = e * inv                                        # softmax / d_out, constant per chunk

    # 4) Weighted fusion: scale each chunk by its weight, chunk-sum on the MXU.
    fused = (att * h_bf).astype(s_ref.dtype)             # (TN, G*D_out) bf16
    o_ref[...] = jnp.dot(
        fused, s_ref[...], preferred_element_type=jnp.float32
    ).astype(o_ref.dtype)


def _pick_tile_n(n):
    """grid=1 on single-TC chips (v5e/v6e); keep grid>=2 on dual-TC v7x."""
    try:
        kind = jax.devices()[0].device_kind.lower()
    except Exception:
        kind = ""
    dual_tc = ("v7" in kind) or ("7x" in kind)
    if dual_tc and n >= 16:
        t = min(2048, n // 2)       # both TensorCores get work; tiles amortize step overhead
    else:
        t = min(512, n)             # single TC: avoid extra grid-step overhead
    while n % t:
        t //= 2
    return max(t, 1)


def attention_fusion(x, W, b, aw, *, tile_n=None, param_dtype=jnp.bfloat16):
    """x: (G, N, D_in); W: (G, D_in, D_out) (pre-transposed Linear weights);
    b: (G, D_out); aw: (1, D_OUT).  Attention bias omitted (exact softmax no-op).
    Matmul inputs are cast to `param_dtype` (bf16 = native MXU input); all accumulation,
    bias/relu and the softmax run in f32."""
    g, n, d_in = x.shape
    d_out = W.shape[-1]
    assert g == G
    if tile_n is None:
        tile_n = _pick_tile_n(n)
    tile_n = min(tile_n, n)
    assert n % tile_n == 0, "N must be divisible by tile_n"
    assert tile_n == n or tile_n % 8 == 0

    dk = G * d_in    # packed contraction width  (128 when d_in = 32)
    do = G * d_out   # packed hidden width       (128 when d_out = 32)

    # ---- one-time XLA-side packing (outside the kernel) ----
    # TODO(synk): have the upstream graph encoders emit x already in (N, G*D_in) layout so this
    # HBM relayout disappears; casting to bf16 *before* the transpose already halves its traffic.
    x_packed = jnp.transpose(x.astype(param_dtype), (1, 0, 2)).reshape(n, dk)     # (N, G*D_in)

    W_bd = jax.scipy.linalg.block_diag(*[W[i] for i in range(G)]).astype(param_dtype)  # (dk, do)
    b_packed = b.reshape(1, do).astype(jnp.float32)

    # Merged score+broadcast matrix: block-diagonal; inside chunk g every column holds aw,
    # so h @ A_bcast gives each graph's score replicated over its d_out lanes (no mask needed).
    blk = jnp.broadcast_to(aw.reshape(d_out, 1), (d_out, d_out))
    A_bcast = jnp.kron(jnp.eye(G, dtype=jnp.float32), blk).astype(param_dtype)         # (do, do)

    # Chunk-sum matrix with the 1/d_out replication factor folded in (exact: 32 = 2^5).
    S = (jnp.kron(jnp.ones((G, 1), jnp.float32), jnp.eye(d_out, dtype=jnp.float32))
         * float(d_out)).astype(param_dtype)                                            # (do, d_out)

    itemsize = jnp.dtype(param_dtype).itemsize
    flops = 2 * n * (dk * do + do * do + do * d_out)
    bytes_accessed = ((n * dk + dk * do + do * do + do * d_out) * itemsize
                      + do * 4 + n * d_out * 4)
    cost = pl.CostEstimate(flops=flops, transcendentals=n * do,
                           bytes_accessed=bytes_accessed)

    grid = (n // tile_n,)
    return pl.pallas_call(
        attention_fusion_kernel,
        out_shape=jax.ShapeDtypeStruct((n, d_out), jnp.float32),
        grid_spec=pltpu.PrefetchScalarGridSpec(
            num_scalar_prefetch=0,
            grid=grid,
            in_specs=[
                pl.BlockSpec((tile_n, dk), lambda i: (i, 0)),   # x tile: only per-step DMA
                pl.BlockSpec((dk, do), lambda i: (0, 0)),       # constants: DMA'd once
                pl.BlockSpec((1, do), lambda i: (0, 0)),
                pl.BlockSpec((do, do), lambda i: (0, 0)),
                pl.BlockSpec((do, d_out), lambda i: (0, 0)),
            ],
            out_specs=pl.BlockSpec((tile_n, d_out), lambda i: (i, 0)),
        ),
        compiler_params=pltpu.CompilerParams(dimension_semantics=("parallel",)),
        cost_estimate=cost,
    )(x_packed, W_bd, b_packed, A_bcast, S)


def reference(x, W, b, aw, ab):
    # pure-JAX f32 reference matching the PyTorch forward (includes the attention bias,
    # which cancels in the softmax — the kernel omits it).
    h = jax.nn.relu(jnp.einsum("gnd,gdo->gno", x, W) + b[:, None, :])     # (G, N, D_out)
    s = jnp.sum(h * aw[None, :, :], axis=-1, keepdims=True) + ab[0, 0]    # (G, N, 1)
    w = jax.nn.softmax(s, axis=0)
    return jnp.sum(w * h, axis=0)


if __name__ == "__main__":
    key = jax.random.PRNGKey(0)
    k_x, k_w, k_b, k_aw, k_ab = jax.random.split(key, 5)

    N, D_IN, D_OUT = 512, 32, 32   # G*D_IN = G*D_OUT = 128 -> fully lane-dense packing

    # 4 graph outputs, each (N, D_IN), stacked along axis 0
    x = jax.random.normal(k_x, (G, N, D_IN), dtype=jnp.float32)

    # Deterministic synthetic parameters (Linear weights pre-transposed to (D_IN, D_OUT))
    W = jax.random.normal(k_w, (G, D_IN, D_OUT), dtype=jnp.float32) * 0.1
    b = jax.random.normal(k_b, (G, D_OUT), dtype=jnp.float32) * 0.1
    aw = jax.random.normal(k_aw, (1, D_OUT), dtype=jnp.float32) * 0.1
    ab = jax.random.normal(k_ab, (1, 1), dtype=jnp.float32) * 0.1

    out = attention_fusion(x, W, b, aw)   # auto tile: grid=1 on v5e/v6e, >=2 on v7x
    out = jax.block_until_ready(out)

    ref = reference(x, W, b, aw, ab)
    assert out.shape == (N, D_OUT)
    # bf16 matmul inputs (f32 accumulation) + approx softmax reciprocal -> loosened tolerance
    # vs the all-f32 reference.
    assert jnp.allclose(out, ref, atol=2e-2, rtol=2e-2), "mismatch vs reference"

    print("KERNEL_OK")
</pallas_src>

<mosaic_0001>
module attributes {stable_mosaic.version = 11 : i64} {
  func.func @attention_fusion_kernel(%arg0: i32, %arg1: memref<512x128xbf16, #tpu.memory_space<vmem>>, %arg2: memref<128x128xbf16, #tpu.memory_space<vmem>>, %arg3: memref<1x128xf32, #tpu.memory_space<vmem>>, %arg4: memref<128x128xbf16, #tpu.memory_space<vmem>>, %arg5: memref<128x32xbf16, #tpu.memory_space<vmem>>, %arg6: memref<512x32xf32, #tpu.memory_space<vmem>>) attributes {dimension_semantics = [#tpu.dimension_semantics<parallel>], iteration_bounds = array<i64: 1>, scalar_prefetch = 0 : i64, scratch_operands = 0 : i64, tpu.core_type = #tpu.core_type<tc>, window_params = [{transform_indices = @transform_0, window_bounds = array<i64: 512, 128>}, {pipeline_mode = #tpu.pipeline_mode<synchronous>, transform_indices = @transform_1, window_bounds = array<i64: 128, 128>}, {pipeline_mode = #tpu.pipeline_mode<synchronous>, transform_indices = @transform_2, window_bounds = array<i64: 1, 128>}, {pipeline_mode = #tpu.pipeline_mode<synchronous>, transform_indices = @transform_3, window_bounds = array<i64: 128, 128>}, {pipeline_mode = #tpu.pipeline_mode<synchronous>, transform_indices = @transform_4, window_bounds = array<i64: 128, 32>}, {transform_indices = @transform_5, window_bounds = array<i64: 512, 32>}]} {
    %c0 = arith.constant 0 : index
    %c0_0 = arith.constant 0 : index
    %0 = vector.load %arg1[%c0, %c0_0] : memref<512x128xbf16, #tpu.memory_space<vmem>>, vector<512x128xbf16>
    %c0_1 = arith.constant 0 : index
    %c0_2 = arith.constant 0 : index
    %1 = vector.load %arg2[%c0_1, %c0_2] : memref<128x128xbf16, #tpu.memory_space<vmem>>, vector<128x128xbf16>
    %cst = arith.constant dense<0.000000e+00> : vector<512x128xf32>
    %2 = tpu.matmul %0, %1, %cst {dimension_numbers = #tpu.dot_dimension_numbers<[1], [0], [0], [1], [0, 0, 1, 1], [], []>} : vector<512x128xbf16>, vector<128x128xbf16>, vector<512x128xf32> -> vector<512x128xf32>
    %c0_3 = arith.constant 0 : index
    %c0_4 = arith.constant 0 : index
    %3 = vector.load %arg3[%c0_3, %c0_4] : memref<1x128xf32, #tpu.memory_space<vmem>>, vector<1x128xf32>
    %4 = vector.broadcast %3 : vector<1x128xf32> to vector<512x128xf32>
    %5 = arith.addf %2, %4 : vector<512x128xf32>
    %cst_5 = arith.constant 0.000000e+00 : f32
    %6 = vector.broadcast %cst_5 : f32 to vector<512x128xf32>
    %7 = arith.maximumf %5, %6 : vector<512x128xf32>
    %8 = arith.truncf %7 : vector<512x128xf32> to vector<512x128xbf16>
    %c0_6 = arith.constant 0 : index
    %c0_7 = arith.constant 0 : index
    %9 = vector.load %arg4[%c0_6, %c0_7] : memref<128x128xbf16, #tpu.memory_space<vmem>>, vector<128x128xbf16>
    %cst_8 = arith.constant dense<0.000000e+00> : vector<512x128xf32>
    %10 = tpu.matmul %8, %9, %cst_8 {dimension_numbers = #tpu.dot_dimension_numbers<[1], [0], [0], [1], [0, 0, 1, 1], [], []>} : vector<512x128xbf16>, vector<128x128xbf16>, vector<512x128xf32> -> vector<512x128xf32>
    %cst_9 = arith.constant dense<0xFF800000> : vector<512xf32>
    %11 = vector.multi_reduction <maximumf>, %10, %cst_9 [1] : vector<512x128xf32> to vector<512xf32>
    %12 = vector.shape_cast %11 : vector<512xf32> to vector<512x1xf32>
    %13 = vector.broadcast %12 : vector<512x1xf32> to vector<512x128xf32>
    %14 = arith.subf %10, %13 : vector<512x128xf32>
    %15 = math.exp %14 : vector<512x128xf32>
    %cst_10 = arith.constant dense<0.000000e+00> : vector<512xf32>
    %16 = vector.multi_reduction <add>, %15, %cst_10 [1] : vector<512x128xf32> to vector<512xf32>
    %17 = vector.shape_cast %16 : vector<512xf32> to vector<512x1xf32>
    %18 = tpu.reciprocal %17 {approx = true} : vector<512x1xf32> -> vector<512x1xf32>
    %19 = vector.broadcast %18 : vector<512x1xf32> to vector<512x128xf32>
    %20 = arith.mulf %15, %19 : vector<512x128xf32>
    %21 = arith.extf %8 : vector<512x128xbf16> to vector<512x128xf32>
    %22 = arith.mulf %20, %21 : vector<512x128xf32>
    %23 = arith.truncf %22 : vector<512x128xf32> to vector<512x128xbf16>
    %c0_11 = arith.constant 0 : index
    %c0_12 = arith.constant 0 : index
    %24 = vector.load %arg5[%c0_11, %c0_12] : memref<128x32xbf16, #tpu.memory_space<vmem>>, vector<128x32xbf16>
    %cst_13 = arith.constant dense<0.000000e+00> : vector<512x32xf32>
    %25 = tpu.matmul %23, %24, %cst_13 {dimension_numbers = #tpu.dot_dimension_numbers<[1], [0], [0], [1], [0, 0, 1, 1], [], []>} : vector<512x128xbf16>, vector<128x32xbf16>, vector<512x32xf32> -> vector<512x32xf32>
    %c0_14 = arith.constant 0 : index
    %c0_15 = arith.constant 0 : index
    %26 = vector.load %arg6[%c0_14, %c0_15] : memref<512x32xf32, #tpu.memory_space<vmem>>, vector<512x32xf32>
    tpu.vector_store %arg6[%c0_14, %c0_15], %25 {strides = array<i32>} : memref<512x32xf32, #tpu.memory_space<vmem>>, vector<512x32xf32>,
    return
  }
  func.func @transform_0(%arg0: i32) -> (i32, i32) {
    %c0_i32 = arith.constant 0 : i32
    %c0_i32_0 = arith.constant 0 : i32
    return %arg0, %c0_i32 : i32, i32
  }
  func.func @transform_1(%arg0: i32) -> (i32, i32) {
    %c0_i32 = arith.constant 0 : i32
    %c0_i32_0 = arith.constant 0 : i32
    %c0_i32_1 = arith.constant 0 : i32
    return %c0_i32, %c0_i32_0 : i32, i32
  }
  func.func @transform_2(%arg0: i32) -> (i32, i32) {
    %c0_i32 = arith.constant 0 : i32
    %c0_i32_0 = arith.constant 0 : i32
    %c0_i32_1 = arith.constant 0 : i32
    return %c0_i32, %c0_i32_0 : i32, i32
  }
  func.func @transform_3(%arg0: i32) -> (i32, i32) {
    %c0_i32 = arith.constant 0 : i32
    %c0_i32_0 = arith.constant 0 : i32
    %c0_i32_1 = arith.constant 0 : i32
    return %c0_i32, %c0_i32_0 : i32, i32
  }
  func.func @transform_4(%arg0: i32) -> (i32, i32) {
    %c0_i32 = arith.constant 0 : i32
    %c0_i32_0 = arith.constant 0 : i32
    %c0_i32_1 = arith.constant 0 : i32
    return %c0_i32, %c0_i32_0 : i32, i32
  }
  func.func @transform_5(%arg0: i32) -> (i32, i32) {
    %c0_i32 = arith.constant 0 : i32
    %c0_i32_0 = arith.constant 0 : i32
    return %arg0, %c0_i32 : i32, i32
  }
}

</mosaic_0001>

<bundles_post_ra>
// kernel: tpu_custom_call.1
= control target key start
LH: loop header
LB: loop body
LE: loop exit
PB: predicated region body
PF: predicated region fallthrough
CT: control target
= control target key end

     0   :  { %10 = vsyncpa [#allocation3], 0  ;;  %s4212_s0 = inlined_call_operand.hbm [shape: bf16[512,128], index: 0, kind: input, shape index: {}]   ;;  %s4213_s1 = inlined_call_operand.vmem [shape: bf16[128,128], index: 1, kind: input, shape index: {}]   ;;  %s4214_s2 = inlined_call_operand.vmem [shape: f32[1,128], index: 2, kind: input, shape index: {}]   ;;  %s4215_s3 = inlined_call_operand.hbm [shape: bf16[128,128], index: 3, kind: input, shape index: {}]   ;;  %s4216_s4 = inlined_call_operand.vmem [shape: bf16[128,32], index: 4, kind: input, shape index: {}]   ;;  %s4217_s5 = inlined_call_operand.vmem [shape: f32[512,32], index: 5, kind: output, shape index: {}]  }
   0x1   :  { %11 = vsyncpa [#allocation5], 0  ;;  %s3067_s18 = smov [#allocation2]  }
   0x2   :  { %s17_s19 = sshll.u32 %s3067_s18, 4  ;;  %s18_s19 = int_to_ptr.vmem [resolvable:$true] %s17_s19 }
   0x3   :  { %s3031_s20 = scalar_lea.vmem %s18_s19, 4096  ;;  %p3036_p1 = scmp.lt.s32.totalorder %s18_s19, %s18_s19 }
   0x4   :  { %p3032_p0 = scmp.ne.s32.totalorder %s18_s19, %s3031_s20  ;;  %p3037_p2 = scmp.lt.s32.totalorder %s3031_s20, %s3031_s20 }
   0x6   :  { %p3038_p3 = por %p3037_p2, %p3036_p1 }
   0x8   :  { %p3039_p4 = pnand %p3038_p3, %p3032_p0 }
   0xa   :  { %3042 = shalt.err (!%p3039_p4)
}
   0xb   :  { %s3068_s21 = smov 64   ;;  %s3069_s22 = smov 4  }
   0xc   :  { %23 = dma.hbm_to_vmem [thread:$0]  %s4212_s0, 4096, %s18_s19, [#allocation3], %s3068_s21, %s3068_s21, %s3069_s22  }
   0xd   :  { %s3070_s25 = smov [#allocation4]  }
   0xe   :  { %s33_s26 = sshll.u32 %s3070_s25, 4  ;;  %s34_s26 = int_to_ptr.vmem [resolvable:$true] %s33_s26 }
   0xf   :  { %s3051_s27 = scalar_lea.vmem %s34_s26, 1024  ;;  %p3056_p6 = scmp.lt.s32.totalorder %s34_s26, %s34_s26 }
  0x10   :  { %p3052_p5 = scmp.ne.s32.totalorder %s34_s26, %s3051_s27  ;;  %p3057_p7 = scmp.lt.s32.totalorder %s3051_s27, %s3051_s27 }
  0x12   :  { %p3058_p8 = por %p3057_p7, %p3056_p6 }
  0x14   :  { %p3059_p9 = pnand %p3058_p8, %p3052_p5 }
  0x16   :  { %3062 = shalt.err (!%p3059_p9)
}
  0x17   :  { %39 = dma.hbm_to_vmem [thread:$0]  %s4215_s3, 1024, %s34_s26, [#allocation5], %s3068_s21, %s3068_s21, %s3069_s22  }
  0x18   :  { %3063 = dma.done.wait [#allocation3], 4096  }
  0x19   :  { %3064 = vsyncadd [#allocation3], 4294963200 }
  0x1a   :  { %3065 = dma.done.wait [#allocation5], 1024  }
  0x1b   :  { %3066 = vsyncadd [#allocation5], 4294966272  ;;  %v2711_v0 = vld [vmem:[%s4213_s1 + $0x38] sm:$0xff]   ;;  %v2712_v1 = vld [vmem:[%s4213_s1 + $0x30] sm:$0xff]   ;;  %vm2203_vm0 = vcmask 261120  }
  0x1c   :  { %2451 = vmatprep.subr.bf16.mxu0 %v2711_v0  ;;  %2691 = vmatprep.subr.bf16.mxu1 %v2711_v0  ;;  %v2713_v2 = vld [vmem:[%s4213_s1 + $0x28] sm:$0xff]   ;;  %v2714_v3 = vld [vmem:[%s4213_s1 + $0x20] sm:$0xff]   ;;  %v2715_v5 = vld [vmem:[%s4213_s1 + $0x18] sm:$0xff]  }
  0x1d   :  { %2452 = vmatpush3.bf16.msra.mxu0 %v2711_v0  ;;  %2699 = vmatpush3.bf16.msra.mxu1 %v2711_v0  ;;  %v2719_v4 = vld [vmem:[#allocation2] sm:$0xff]   ;;  %v2716_v6 = vld [vmem:[%s4213_s1 + $0x10] sm:$0xff]   ;;  %v2717_v7 = vld [vmem:[%s4213_s1 + $0x8] sm:$0xff]  }
  0x1e   :  { %2453 = vmatprep.subr.bf16.mxu0 %v2712_v1  ;;  %2692 = vmatprep.subr.bf16.mxu1 %v2712_v1  ;;  %v2718_v8 = vld [vmem:[%s4213_s1] sm:$0xff]   ;;  %v2720_v10 = vld [vmem:[#allocation2 + $0x8] sm:$0xff]   ;;  %v2721_v11 = vld [vmem:[#allocation2 + $0x10] sm:$0xff]  }
  0x1f   :  { %2467 = vmatprep.mubr.bf16.mxu0 %v2719_v4  ;;  %v2735_v9 = vld [vmem:[#allocation2 + $0x80] sm:$0xff]   ;;  %v2736_v12 = vld [vmem:[#allocation2 + $0x88] sm:$0xff]   ;;  %v2737_v13 = vld [vmem:[#allocation2 + $0x90] sm:$0xff]  }
  0x20   :  { %2499 = vmatprep.mubr.bf16.mxu1 %v2735_v9  ;;  %v2722_v14 = vld [vmem:[#allocation2 + $0x18] sm:$0xff]   ;;  %v2723_v15 = vld [vmem:[#allocation2 + $0x20] sm:$0xff]   ;;  %v2752_v19 = vld [vmem:[#allocation4 + $0x30] sm:$0xff]  }
  0x21   :  { %2454 = vmatpush3.bf16.msra.mxu0 %v2712_v1  ;;  %2700 = vmatpush3.bf16.msra.mxu1 %v2712_v1  ;;  %v2738_v16 = vld [vmem:[#allocation2 + $0x98] sm:$0xff]   ;;  %v2739_v17 = vld [vmem:[#allocation2 + $0xa0] sm:$0xff]   ;;  %v2724_v20 = vld [vmem:[#allocation2 + $0x28] sm:$0xff]  }
  0x22   :  { %2455 = vmatprep.subr.bf16.mxu0 %v2713_v2  ;;  %2693 = vmatprep.subr.bf16.mxu1 %v2713_v2  ;;  %v2751_v18 = vld [vmem:[#allocation4 + $0x38] sm:$0xff]   ;;  %v2740_v21 = vld [vmem:[#allocation2 + $0xa8] sm:$0xff]   ;;  %v2725_v22 = vld [vmem:[#allocation2 + $0x30] sm:$0xff]  }
  0x23   :  { %v2741_v23 = vld [vmem:[#allocation2 + $0xb0] sm:$0xff]   ;;  %v2753_v24 = vld [vmem:[#allocation4 + $0x28] sm:$0xff]   ;;  %v2754_v25 = vld [vmem:[#allocation4 + $0x20] sm:$0xff]  }
  0x24   :  { %v2726_v26 = vld [vmem:[#allocation2 + $0x38] sm:$0xff]   ;;  %v2727_v28 = vld [vmem:[#allocation2 + $0x40] sm:$0xff]   ;;  %v2756_v31 = vld [vmem:[#allocation4 + $0x10] sm:$0xff]  }
  0x25   :  { %2456 = vmatpush3.bf16.msra.mxu0 %v2713_v2  ;;  %2701 = vmatpush3.bf16.msra.mxu1 %v2713_v2  ;;  %v2742_v27 = vld [vmem:[#allocation2 + $0xb8] sm:$0xff]   ;;  %v2743_v29 = vld [vmem:[#allocation2 + $0xc0] sm:$0xff]   ;;  %v2728_v32 = vld [vmem:[#allocation2 + $0x48] sm:$0xff]  }
  0x26   :  { %2457 = vmatprep.subr.bf16.mxu0 %v2714_v3  ;;  %2694 = vmatprep.subr.bf16.mxu1 %v2714_v3  ;;  %v2755_v30 = vld [vmem:[#allocation4 + $0x18] sm:$0xff]   ;;  %v2744_v33 = vld [vmem:[#allocation2 + $0xc8] sm:$0xff]   ;;  %v2729_v34 = vld [vmem:[#allocation2 + $0x50] sm:$0xff]  }
  0x27   :  { %v2745_v35 = vld [vmem:[#allocation2 + $0xd0] sm:$0xff]   ;;  %v2757_v36 = vld [vmem:[#allocation4 + $0x8] sm:$0xff]   ;;  %v2730_v37 = vld [vmem:[#allocation2 + $0x58] sm:$0xff]  }
  0x28   :  { %v2746_v38 = vld [vmem:[#allocation2 + $0xd8] sm:$0xff]   ;;  %v2731_v39 = vld [vmem:[#allocation2 + $0x60] sm:$0xff]   ;;  %v2732_v41 = vld [vmem:[#allocation2 + $0x68] sm:$0xff]  }
  0x29   :  { %2458 = vmatpush3.bf16.msra.mxu0 %v2714_v3  ;;  %2702 = vmatpush3.bf16.msra.mxu1 %v2714_v3  ;;  %v2747_v40 = vld [vmem:[#allocation2 + $0xe0] sm:$0xff]   ;;  %v2748_v42 = vld [vmem:[#allocation2 + $0xe8] sm:$0xff]   ;;  %v2733_v43 = vld [vmem:[#allocation2 + $0x70] sm:$0xff]  }
  0x2a   :  { %2459 = vmatprep.subr.bf16.mxu0 %v2715_v5  ;;  %2695 = vmatprep.subr.bf16.mxu1 %v2715_v5  ;;  %v2749_v44 = vld [vmem:[#allocation2 + $0xf0] sm:$0xff]   ;;  %v2734_v45 = vld [vmem:[#allocation2 + $0x78] sm:$0xff]   ;;  %v2758_v47 = vld [vmem:[#allocation4] sm:$0xff]  }
  0x2b   :  { %v2750_v46 = vld [vmem:[#allocation2 + $0xf8] sm:$0xff]   ;;  %v3138_v52 = vld [vmem:[%s4214_s2] ss:$0 sm:$0xff] }
  0x2d   :  { %2460 = vmatpush3.bf16.msra.mxu0 %v2715_v5  ;;  %2703 = vmatpush3.bf16.msra.mxu1 %v2715_v5 }
  0x2e   :  { %2461 = vmatprep.subr.bf16.mxu0 %v2716_v6  ;;  %2696 = vmatprep.subr.bf16.mxu1 %v2716_v6 }
  0x31   :  { %2462 = vmatpush3.bf16.msra.mxu0 %v2716_v6  ;;  %2704 = vmatpush3.bf16.msra.mxu1 %v2716_v6 }
  0x32   :  { %2463 = vmatprep.subr.bf16.mxu0 %v2717_v7  ;;  %2697 = vmatprep.subr.bf16.mxu1 %v2717_v7 }
  0x35   :  { %2464 = vmatpush3.bf16.msra.mxu0 %v2717_v7  ;;  %2705 = vmatpush3.bf16.msra.mxu1 %v2717_v7 }
  0x36   :  { %2465 = vmatprep.subr.bf16.mxu0 %v2718_v8  ;;  %2698 = vmatprep.subr.bf16.mxu1 %v2718_v8 }
  0x39   :  { %2466 = vmatpush3.bf16.msra.mxu0 %v2718_v8  ;;  %2706 = vmatpush3.bf16.msra.mxu1 %v2718_v8 }
  0x3a   :  { %2531 = vmatprep.subr.bf16.mxu1 %v2751_v18 }
  0x3c   :  { %2468 = vmatmul.mubr.bf16.vlgmr.msra.gmra.mxu0 %v2720_v10  ;;  %2500 = vmatmul.mubr.bf16.vlgmr.msra.gmra.mxu1 %v2736_v12 }
  0x3d   :  { %2471 = vmatprep.mubr.bf16.mxu0 %v2721_v11  ;;  %2503 = vmatprep.mubr.bf16.mxu1 %v2737_v13 }
  0x3e   :  { %2532 = vmatpush3.bf16.msra.mxu1 %v2751_v18 }
  0x3f   :  { %2533 = vmatprep.subr.bf16.mxu1 %v2752_v19 }
  0x42   :  { %2534 = vmatpush3.bf16.msra.mxu1 %v2752_v19 }
  0x43   :  { %2535 = vmatprep.subr.bf16.mxu1 %v2753_v24 }
  0x44   :  { %2472 = vmatmul.mubr.bf16.gmra.mxu0 %v2722_v14  ;;  %2504 = vmatmul.mubr.bf16.gmra.mxu1 %v2738_v16 }
  0x45   :  { %2475 = vmatprep.mubr.bf16.mxu0 %v2723_v15  ;;  %2507 = vmatprep.mubr.bf16.mxu1 %v2739_v17 }
  0x46   :  { %2536 = vmatpush3.bf16.msra.mxu1 %v2753_v24 }
  0x47   :  { %2537 = vmatprep.subr.bf16.mxu1 %v2754_v25 }
  0x4a   :  { %2538 = vmatpush3.bf16.msra.mxu1 %v2754_v25 }
  0x4b   :  { %2539 = vmatprep.subr.bf16.mxu1 %v2755_v30 }
  0x4c   :  { %2476 = vmatmul.mubr.bf16.gmra.mxu0 %v2724_v20  ;;  %2508 = vmatmul.mubr.bf16.gmra.mxu1 %v2740_v21 }
  0x4d   :  { %2479 = vmatprep.mubr.bf16.mxu0 %v2725_v22  ;;  %2511 = vmatprep.mubr.bf16.mxu1 %v2741_v23 }
  0x4e   :  { %2540 = vmatpush3.bf16.msra.mxu1 %v2755_v30 }
  0x4f   :  { %2541 = vmatprep.subr.bf16.mxu1 %v2756_v31 }
  0x52   :  { %2542 = vmatpush3.bf16.msra.mxu1 %v2756_v31 }
  0x53   :  { %2543 = vmatprep.subr.bf16.mxu1 %v2757_v36 }
  0x54   :  { %2480 = vmatmul.mubr.bf16.gmra.mxu0 %v2726_v26  ;;  %2512 = vmatmul.mubr.bf16.gmra.mxu1 %v2742_v27 }
  0x55   :  { %2483 = vmatprep.mubr.bf16.mxu0 %v2727_v28  ;;  %2515 = vmatprep.mubr.bf16.mxu1 %v2743_v29 }
  0x56   :  { %2544 = vmatpush3.bf16.msra.mxu1 %v2757_v36 }
  0x57   :  { %2545 = vmatprep.subr.bf16.mxu1 %v2758_v47 }
  0x5a   :  { %2546 = vmatpush3.bf16.msra.mxu1 %v2758_v47 }
  0x5c   :  { %2484 = vmatmul.mubr.bf16.gmra.mxu0 %v2728_v32  ;;  %2516 = vmatmul.mubr.bf16.gmra.mxu1 %v2744_v33 }
  0x5d   :  { %2487 = vmatprep.mubr.bf16.mxu0 %v2729_v34  ;;  %2519 = vmatprep.mubr.bf16.mxu1 %v2745_v35 }
  0x64   :  { %2488 = vmatmul.mubr.bf16.gmra.mxu0 %v2730_v37  ;;  %2520 = vmatmul.mubr.bf16.gmra.mxu1 %v2746_v38 }
  0x65   :  { %2491 = vmatprep.mubr.bf16.mxu0 %v2731_v39  ;;  %2523 = vmatprep.mubr.bf16.mxu1 %v2747_v40 }
  0x6c   :  { %2492 = vmatmul.mubr.bf16.gmra.mxu0 %v2732_v41  ;;  %2524 = vmatmul.mubr.bf16.gmra.mxu1 %v2748_v42 }
  0x6d   :  { %2495 = vmatprep.mubr.bf16.mxu0 %v2733_v43  ;;  %2527 = vmatprep.mubr.bf16.mxu1 %v2749_v44 }
  0x74   :  { %2496 = vmatmul.mubr.bf16.gmra.mxu0 %v2734_v45  ;;  %2528 = vmatmul.mubr.bf16.gmra.mxu1 %v2750_v46 }
  0xfc   :  { %v2469_v48 = vpop.f32.mrf.mxu0  ;;  %v3131_v49 = vpop.f32.mrf.mxu1 }
  0xfd   :  { %v419_v57 = vadd.f32 %v2469_v48, %v3138_v52 }
  0xfe   :  { %v410_v50 = vpop.f32.mrf.mxu0  ;;  %v3133_v51 = vpop.f32.mrf.mxu1 }
  0xff   :  { %v411_v55 = vadd.f32 %v3138_v52, %v410_v50  ;;  %v667_v2 = vmax.f32 %v419_v57, 0.0 }
 0x100   :  { %v2470_v53 = vpop.f32.mrf.mxu0  ;;  %v3140_v54 = vpop.f32.mrf.mxu1 }
 0x101   :  { %v422_v56 = vadd.f32 %v2470_v53, %v3138_v52  ;;  %v665_v0 = vmax.f32 %v411_v55, 0.0 }
 0x102   :  { %v413_v58 = vpop.f32.mrf.mxu0  ;;  %v3145_v59 = vpop.f32.mrf.mxu1 }
 0x103   :  { %v414_v60 = vadd.f32 %v3138_v52, %v413_v58  ;;  %v668_v61 = vmax.f32 %v422_v56, 0.0 }
 0x104   :  { %v2473_v62 = vpop.f32.mrf.mxu0  ;;  %v3148_v63 = vpop.f32.mrf.mxu1 }
 0x105   :  { %v666_v1 = vmax.f32 %v414_v60, 0.0  ;;  %v3154_v6 = vpack.c.bf16 %v668_v61, %v667_v2  ;;  %v435_v11 = vadd.f32 %v2473_v62, %v3138_v52 }
 0x106   :  { %v426_v3 = vpop.f32.mrf.mxu0  ;;  %v3150_v4 = vpop.f32.mrf.mxu1 }
 0x107   :  { %v3152_v5 = vpack.c.bf16 %v666_v1, %v665_v0  ;;  %4318 = vst [vmem:[#allocation9_spill] sm:$0xff] %v3154_v6  ;;  %v427_v9 = vadd.f32 %v3138_v52, %v426_v3  ;;  %v671_v19 = vmax.f32 %v435_v11, 0.0 }
 0x108   :  { %v2474_v7 = vpop.f32.mrf.mxu0  ;;  %v3156_v8 = vpop.f32.mrf.mxu1 }
 0x109   :  { %4317 = vst [vmem:[#allocation8_spill] sm:$0xff] %v3152_v5  ;;  %v438_v10 = vadd.f32 %v2474_v7, %v3138_v52  ;;  %2547 = vmatprep.mubr.bf16.mxu1 %v3152_v5  ;;  %v669_v17 = vmax.f32 %v427_v9, 0.0 }
 0x10a   :  { %v429_v12 = vpop.f32.mrf.mxu0  ;;  %2548 = vmatmul.mubr.bf16.vlgmr.msra.gmra.mxu1 %v3154_v6  ;;  %v3164_v16 = vpop.f32.mrf.mxu1 }
 0x10b   :  { %v430_v13 = vadd.f32 %v3138_v52, %v429_v12  ;;  %v672_v14 = vmax.f32 %v438_v10, 0.0 }
 0x10c   :  { %v2477_v15 = vpop.f32.mrf.mxu0  ;;  %v3170_v24 = vpop.f32.mrf.mxu1 }
 0x10d   :  { %v670_v18 = vmax.f32 %v430_v13, 0.0  ;;  %v3168_v22 = vpack.c.bf16 %v672_v14, %v671_v19  ;;  %v451_v27 = vadd.f32 %v2477_v15, %v3138_v52 }
 0x10e   :  { %v442_v20 = vpop.f32.mrf.mxu0  ;;  %v3178_v32 = vpop.f32.mrf.mxu1 }
 0x10f   :  { %v3166_v21 = vpack.c.bf16 %v670_v18, %v669_v17  ;;  %4320 = vst [vmem:[#allocation11_spill] sm:$0xff] %v3168_v22  ;;  %v443_v25 = vadd.f32 %v3138_v52, %v442_v20  ;;  %v675_v35 = vmax.f32 %v451_v27, 0.0 }
 0x110   :  { %v2478_v23 = vpop.f32.mrf.mxu0  ;;  %v3184_v40 = vpop.f32.mrf.mxu1 }
 0x111   :  { %4319 = vst [vmem:[#allocation10_spill] sm:$0xff] %v3166_v21  ;;  %v454_v26 = vadd.f32 %v2478_v23, %v3138_v52  ;;  %2551 = vmatprep.mubr.bf16.mxu1 %v3166_v21  ;;  %v673_v33 = vmax.f32 %v443_v25, 0.0 }
 0x112   :  { %v445_v28 = vpop.f32.mrf.mxu0  ;;  %2552 = vmatmul.mubr.bf16.gmra.mxu1 %v3168_v22  ;;  %v3192_v48 = vpop.f32.mrf.mxu1 }
 0x113   :  { %v446_v29 = vadd.f32 %v3138_v52, %v445_v28  ;;  %v676_v30 = vmax.f32 %v454_v26, 0.0 }
 0x114   :  { %v2481_v31 = vpop.f32.mrf.mxu0  ;;  %v3200_v0 = vpop.f32.mrf.mxu1 }
 0x115   :  { %v674_v34 = vmax.f32 %v446_v29, 0.0  ;;  %v3182_v38 = vpack.c.bf16 %v676_v30, %v675_v35  ;;  %v467_v43 = vadd.f32 %v2481_v31, %v3138_v52 }
 0x116   :  { %v458_v36 = vpop.f32.mrf.mxu0  ;;  %v3206_v12 = vpop.f32.mrf.mxu1 }
 0x117   :  { %v3180_v37 = vpack.c.bf16 %v674_v34, %v673_v33  ;;  %4322 = vst [vmem:[#allocation13_spill] sm:$0xff] %v3182_v38  ;;  %v459_v41 = vadd.f32 %v3138_v52, %v458_v36  ;;  %v679_v55 = vmax.f32 %v467_v43, 0.0 }
 0x118   :  { %v2482_v39 = vpop.f32.mrf.mxu0  ;;  %v3214_v23 = vpop.f32.mrf.mxu1 }
 0x119   :  { %4321 = vst [vmem:[#allocation12_spill] sm:$0xff] %v3180_v37  ;;  %v470_v42 = vadd.f32 %v2482_v39, %v3138_v52  ;;  %2555 = vmatprep.mubr.bf16.mxu1 %v3180_v37  ;;  %v677_v50 = vmax.f32 %v459_v41, 0.0 }
 0x11a   :  { %v461_v44 = vpop.f32.mrf.mxu0  ;;  %2556 = vmatmul.mubr.bf16.gmra.mxu1 %v3182_v38  ;;  %v3220_v33 = vpop.f32.mrf.mxu1 }
 0x11b   :  { %v462_v45 = vadd.f32 %v3138_v52, %v461_v44  ;;  %v680_v46 = vmax.f32 %v470_v42, 0.0 }
 0x11c   :  { %v2485_v47 = vpop.f32.mrf.mxu0  ;;  %v3228_v44 = vpop.f32.mrf.mxu1 }
 0x11d   :  { %v678_v53 = vmax.f32 %v462_v45, 0.0  ;;  %v483_v56 = vadd.f32 %v2485_v47, %v3138_v52  ;;  %v3197_v60 = vpack.c.bf16 %v680_v46, %v679_v55 }
 0x11e   :  { %v474_v57 = vpop.f32.mrf.mxu0 }
 0x11f   :  { %v3195_v58 = vpack.c.bf16 %v678_v53, %v677_v50  ;;  %4324 = vst [vmem:[#allocation15_spill] sm:$0xff] %v3197_v60  ;;  %v475_v61 = vadd.f32 %v3138_v52, %v474_v57  ;;  %v683_v2 = vmax.f32 %v483_v56, 0.0  ;;  %v3234_v57 = vpop.f32.mrf.mxu1 }
 0x120   :  { %v2486_v62 = vpop.f32.mrf.mxu0 }
 0x121   :  { %4323 = vst [vmem:[#allocation14_spill] sm:$0xff] %v3195_v58  ;;  %v486_v1 = vadd.f32 %v2486_v62, %v3138_v52  ;;  %2559 = vmatprep.mubr.bf16.mxu1 %v3195_v58  ;;  %v681_v7 = vmax.f32 %v475_v61, 0.0 }
 0x122   :  { %v477_v3 = vpop.f32.mrf.mxu0  ;;  %2560 = vmatmul.mubr.bf16.gmra.mxu1 %v3197_v60 }
 0x123   :  { %v684_v9 = vmax.f32 %v486_v1, 0.0  ;;  %v478_v10 = vadd.f32 %v3138_v52, %v477_v3  ;;  %v539_v3 = vadd.f32 %v3138_v52, %v3133_v51 }
 0x124   :  { %v2489_v11 = vpop.f32.mrf.mxu0 }
 0x125   :  { %v682_v13 = vmax.f32 %v478_v10, 0.0  ;;  %v3208_v14 = vpack.c.bf16 %v684_v9, %v683_v2  ;;  %v499_v15 = vadd.f32 %v2489_v11, %v3138_v52  ;;  %v542_v9 = vadd.f32 %v3138_v52, %v3145_v59 }
 0x126   :  { %v490_v17 = vpop.f32.mrf.mxu0 }
 0x127   :  { %4325 = vst [vmem:[#allocation16_spill] sm:$0xff] %v3208_v14  ;;  %v3211_v18 = vpack.c.bf16 %v682_v13, %v681_v7  ;;  %v491_v19 = vadd.f32 %v3138_v52, %v490_v17  ;;  %v687_v26 = vmax.f32 %v499_v15, 0.0  ;;  %v3246_v13 = vpop.f32.mrf.mxu1 }
 0x128   :  { %v2490_v20 = vpop.f32.mrf.mxu0 }
 0x129   :  { %4326 = vst [vmem:[#allocation17_spill] sm:$0xff] %v3211_v18  ;;  %v502_v25 = vadd.f32 %v2490_v20, %v3138_v52  ;;  %2563 = vmatprep.mubr.bf16.mxu1 %v3211_v18  ;;  %v685_v28 = vmax.f32 %v491_v19, 0.0  ;;  %v697_v20 = vmax.f32 %v539_v3, 0.0  ;;  %v605_v59 = vpop.f32.mrf.mxu1 }
 0x12a   :  { %v493_v27 = vpop.f32.mrf.mxu0  ;;  %2564 = vmatmul.mubr.bf16.gmra.mxu1 %v3208_v14 }
 0x12b   :  { %v688_v29 = vmax.f32 %v502_v25, 0.0  ;;  %v494_v30 = vadd.f32 %v3138_v52, %v493_v27  ;;  %v698_v27 = vmax.f32 %v542_v9, 0.0 }
 0x12c   :  { %v2493_v31 = vpop.f32.mrf.mxu0 }
 0x12d   :  { %v686_v34 = vmax.f32 %v494_v30, 0.0  ;;  %v3222_v35 = vpack.c.bf16 %v688_v29, %v687_v26  ;;  %v515_v36 = vadd.f32 %v2493_v31, %v3138_v52  ;;  %v547_v30 = vadd.f32 %v3131_v49, %v3138_v52 }
 0x12e   :  { %v506_v39 = vpop.f32.mrf.mxu0  ;;  %v550_v31 = vadd.f32 %v3140_v54, %v3138_v52 }
 0x12f   :  { %4327 = vst [vmem:[#allocation18_spill] sm:$0xff] %v3222_v35  ;;  %v3225_v41 = vpack.c.bf16 %v686_v34, %v685_v28  ;;  %v507_v42 = vadd.f32 %v3138_v52, %v506_v39  ;;  %v691_v46 = vmax.f32 %v515_v36, 0.0  ;;  %v3260_v36 = vpack.c.bf16 %v698_v27, %v697_v20 }
 0x130   :  { %v2494_v43 = vpop.f32.mrf.mxu0  ;;  %v555_v39 = vadd.f32 %v3138_v52, %v3150_v4  ;;  %v563_v4 = vadd.f32 %v3148_v63, %v3138_v52 }
 0x131   :  { %4328 = vst [vmem:[#allocation19_spill] sm:$0xff] %v3225_v41  ;;  %v518_v45 = vadd.f32 %v2494_v43, %v3138_v52  ;;  %2567 = vmatprep.mubr.bf16.mxu1 %v3225_v41  ;;  %v689_v50 = vmax.f32 %v507_v42, 0.0  ;;  %4333 = vst [vmem:[#allocation24_spill] sm:$0xff] %v3260_v36  ;;  %v558_v42 = vadd.f32 %v3138_v52, %v3164_v16  ;;  %v3266_v43 = vpop.f32.mrf.mxu1 }
 0x132   :  { %v509_v47 = vpop.f32.mrf.mxu0  ;;  %2568 = vmatmul.mubr.bf16.gmra.mxu1 %v3222_v35  ;;  %v701_v49 = vmax.f32 %v555_v39, 0.0  ;;  %v566_v16 = vadd.f32 %v3156_v8, %v3138_v52  ;;  %v579_v8 = vadd.f32 %v3170_v24, %v3138_v52 }
 0x133   :  { %v692_v53 = vmax.f32 %v518_v45, 0.0  ;;  %v510_v55 = vadd.f32 %v3138_v52, %v509_v47  ;;  %v699_v45 = vmax.f32 %v547_v30, 0.0  ;;  %v702_v54 = vmax.f32 %v558_v42, 0.0  ;;  %v618_v47 = vpop.f32.mrf.mxu1 }
 0x134   :  { %v2497_v56 = vpop.f32.mrf.mxu0 }
 0x135   :  { %v690_v61 = vmax.f32 %v510_v55, 0.0  ;;  %v3236_v62 = vpack.c.bf16 %v692_v53, %v691_v46  ;;  %v531_v1 = vadd.f32 %v2497_v56, %v3138_v52  ;;  %v700_v46 = vmax.f32 %v550_v31, 0.0 }
 0x136   :  { %v522_v2 = vpop.f32.mrf.mxu0  ;;  %v3277_v53 = vpack.c.bf16 %v702_v54, %v701_v49  ;;  %v571_v55 = vadd.f32 %v3138_v52, %v3178_v32  ;;  %v574_v56 = vadd.f32 %v3138_v52, %v3192_v48  ;;  %v582_v32 = vadd.f32 %v3184_v40, %v3138_v52 }
 0x137   :  { %4329 = vst [vmem:[#allocation20_spill] sm:$0xff] %v3236_v62  ;;  %v3241_v7 = vpack.c.bf16 %v690_v61, %v689_v50  ;;  %v523_v10 = vadd.f32 %v3138_v52, %v522_v2  ;;  %v695_v17 = vmax.f32 %v531_v1, 0.0  ;;  %v3271_v50 = vpack.c.bf16 %v700_v46, %v699_v45  ;;  %v2522_v61 = vpop.f32.mrf.mxu1 }
 0x138   :  { %v2498_v11 = vpop.f32.mrf.mxu0  ;;  %4335 = vst [vmem:[#allocation26_spill] sm:$0xff] %v3277_v53  ;;  %v703_v1 = vmax.f32 %v563_v4, 0.0  ;;  %v704_v2 = vmax.f32 %v566_v16, 0.0  ;;  %v705_v3 = vmax.f32 %v571_v55, 0.0  ;;  %v706_v63 = vmax.f32 %v574_v56, 0.0 }
 0x139   :  { %4330 = vst [vmem:[#allocation21_spill] sm:$0xff] %v3241_v7  ;;  %v534_v15 = vadd.f32 %v2498_v11, %v3138_v52  ;;  %2571 = vmatprep.mubr.bf16.mxu1 %v3241_v7  ;;  %v693_v51 = vmax.f32 %v523_v10, 0.0  ;;  %4334 = vst [vmem:[#allocation25_spill] sm:$0xff] %v3271_v50  ;;  %v621_v9 = vpop.f32.mrf.mxu1  ;;  %v587_v48 = vadd.f32 %v3138_v52, %v3206_v12  ;;  %v708_v20 = vmax.f32 %v582_v32, 0.0 }
 0x13a   :  { %v525_v19 = vpop.f32.mrf.mxu0  ;;  %2572 = vmatmul.mubr.bf16.gmra.mxu1 %v3236_v62  ;;  %v3285_v10 = vpack.c.bf16 %v704_v2, %v703_v1  ;;  %v3291_v11 = vpack.c.bf16 %v706_v63, %v705_v3  ;;  %v595_v40 = vadd.f32 %v3200_v0, %v3138_v52  ;;  %v598_v12 = vadd.f32 %v3214_v23, %v3138_v52 }
 0x13b   :  { %v696_v25 = vmax.f32 %v534_v15, 0.0  ;;  %v526_v26 = vadd.f32 %v3138_v52, %v525_v19  ;;  %v590_v15 = vadd.f32 %v3138_v52, %v3220_v33  ;;  %v707_v19 = vmax.f32 %v579_v8, 0.0 }
 0x13c   :  { %4336 = vst [vmem:[#allocation27_spill] sm:$0xff] %v3285_v10  ;;  %4337 = vst [vmem:[#allocation28_spill] sm:$0xff] %v3291_v11  ;;  %v603_v33 = vadd.f32 %v3138_v52, %v3234_v57  ;;  %v711_v31 = vmax.f32 %v595_v40, 0.0  ;;  %v712_v39 = vmax.f32 %v598_v12, 0.0  ;;  %v611_v23 = vadd.f32 %v3228_v44, %v3138_v52 }
 0x13d   :  { %v694_v28 = vmax.f32 %v526_v26, 0.0  ;;  %v3252_v29 = vpack.c.bf16 %v696_v25, %v695_v17  ;;  %v2525_v17 = vpop.f32.mrf.mxu1  ;;  %v710_v24 = vmax.f32 %v590_v15, 0.0  ;;  %v3299_v26 = vpack.c.bf16 %v708_v20, %v707_v19 }
 0x13e   :  { %v713_v42 = vmax.f32 %v603_v33, 0.0  ;;  %v3312_v46 = vpack.c.bf16 %v712_v39, %v711_v31  ;;  %v614_v57 = vadd.f32 %v3246_v13, %v3138_v52  ;;  %v622_v54 = vadd.f32 %v3138_v52, %v621_v9 }
 0x13f   :  { %4331 = vst [vmem:[#allocation22_spill] sm:$0xff] %v3252_v29  ;;  %v3258_v34 = vpack.c.bf16 %v694_v28, %v693_v51  ;;  %v709_v51 = vmax.f32 %v587_v48, 0.0  ;;  %v634_v25 = vpop.f32.mrf.mxu1  ;;  %4338 = vst [vmem:[#allocation29_spill] sm:$0xff] %v3299_v26  ;;  %v606_v28 = vadd.f32 %v3138_v52, %v605_v59  ;;  %v619_v59 = vadd.f32 %v3138_v52, %v618_v47 }
 0x140   :  { %4340 = vst [vmem:[#allocation31_spill] sm:$0xff] %v3312_v46  ;;  %v715_v16 = vmax.f32 %v611_v23, 0.0  ;;  %v716_v55 = vmax.f32 %v614_v57, 0.0  ;;  %v718_v1 = vmax.f32 %v622_v54, 0.0  ;;  %v627_v13 = vadd.f32 %v3266_v43, %v3138_v52 }
 0x141   :  { %4332 = vst [vmem:[#allocation23_spill] sm:$0xff] %v3258_v34  ;;  %2575 = vmatprep.mubr.bf16.mxu1 %v3258_v34  ;;  %v3305_v27 = vpack.c.bf16 %v710_v24, %v709_v51  ;;  %v2526_v30 = vpop.f32.mrf.mxu1  ;;  %v714_v45 = vmax.f32 %v606_v28, 0.0  ;;  %v717_v56 = vmax.f32 %v619_v59, 0.0  ;;  %v630_v3 = vadd.f32 %v2522_v61, %v3138_v52 }
 0x142   :  { %2576 = vmatmul.mubr.bf16.gmra.mxu1 %v3252_v29  ;;  %v3324_v44 = vpack.c.bf16 %v716_v55, %v715_v16  ;;  %v635_v63 = vadd.f32 %v3138_v52, %v634_v25  ;;  %v719_v32 = vmax.f32 %v627_v13, 0.0  ;;  %v643_v43 = vadd.f32 %v2525_v17, %v3138_v52 }
 0x143   :  { %2579 = vmatprep.mubr.bf16.mxu1 %v3260_v36  ;;  %4339 = vst [vmem:[#allocation30_spill] sm:$0xff] %v3305_v27  ;;  %v637_v0 = vpop.f32.mrf.mxu1  ;;  %v3318_v49 = vpack.c.bf16 %v714_v45, %v713_v42  ;;  %v3329_v47 = vpack.c.bf16 %v718_v1, %v717_v56  ;;  %v720_v48 = vmax.f32 %v630_v3, 0.0  ;;  %v646_v61 = vadd.f32 %v2526_v30, %v3138_v52 }
 0x144   :  { %4342 = vst [vmem:[#allocation33_spill] sm:$0xff] %v3324_v44  ;;  %v638_v9 = vadd.f32 %v3138_v52, %v637_v0  ;;  %v721_v15 = vmax.f32 %v635_v63, 0.0  ;;  %v723_v12 = vmax.f32 %v643_v43, 0.0 }
 0x145   :  { %4341 = vst [vmem:[#allocation32_spill] sm:$0xff] %v3318_v49  ;;  %v2529_v4 = vpop.f32.mrf.mxu1  ;;  %4343 = vst [vmem:[#allocation34_spill] sm:$0xff] %v3329_v47  ;;  %v3335_v51 = vpack.c.bf16 %v720_v48, %v719_v32  ;;  %v724_v33 = vmax.f32 %v646_v61, 0.0 }
 0x146   :  { %v722_v19 = vmax.f32 %v638_v9, 0.0  ;;  %v659_v17 = vadd.f32 %v2529_v4, %v3138_v52 }
 0x147   :  { %v650_v2 = vpop.f32.mrf.mxu1  ;;  %4344 = vst [vmem:[#allocation35_spill] sm:$0xff] %v3335_v51  ;;  %v3345_v39 = vpack.c.bf16 %v724_v33, %v723_v12 }
 0x148   :  { %v3339_v24 = vpack.c.bf16 %v722_v19, %v721_v15  ;;  %v651_v25 = vadd.f32 %v3138_v52, %v650_v2  ;;  %v727_v45 = vmax.f32 %v659_v17, 0.0 }
 0x149   :  { %v2530_v8 = vpop.f32.mrf.mxu1  ;;  %4346 = vst [vmem:[#allocation37_spill] sm:$0xff] %v3345_v39 }
 0x14a   :  { %2580 = vmatmul.mubr.bf16.gmra.mxu1 %v3271_v50  ;;  %4345 = vst [vmem:[#allocation36_spill] sm:$0xff] %v3339_v24  ;;  %v725_v28 = vmax.f32 %v651_v25, 0.0  ;;  %v662_v30 = vadd.f32 %v2530_v8, %v3138_v52 }
 0x14b   :  { %2583 = vmatprep.mubr.bf16.mxu1 %v3277_v53  ;;  %v653_v20 = vpop.f32.mrf.mxu1 }
 0x14c   :  { %v654_v40 = vadd.f32 %v3138_v52, %v653_v20  ;;  %v728_v0 = vmax.f32 %v662_v30, 0.0 }
 0x14e   :  { %v726_v31 = vmax.f32 %v654_v40, 0.0  ;;  %v3353_v23 = vpack.c.bf16 %v728_v0, %v727_v45 }
 0x150   :  { %v3349_v42 = vpack.c.bf16 %v726_v31, %v725_v28  ;;  %4348 = vst [vmem:[#allocation39_spill] sm:$0xff] %v3353_v23 }
 0x152   :  { %2584 = vmatmul.mubr.bf16.gmra.mxu1 %v3285_v10  ;;  %4347 = vst [vmem:[#allocation38_spill] sm:$0xff] %v3349_v42 }
 0x153   :  { %2587 = vmatprep.mubr.bf16.mxu1 %v3291_v11 }
 0x15a   :  { %2588 = vmatmul.mubr.bf16.gmra.mxu1 %v3299_v26 }
 0x15b   :  { %2591 = vmatprep.mubr.bf16.mxu1 %v3305_v27 }
 0x162   :  { %2592 = vmatmul.mubr.bf16.gmra.mxu1 %v3312_v46 }
 0x163   :  { %2595 = vmatprep.mubr.bf16.mxu1 %v3318_v49 }
 0x16a   :  { %2596 = vmatmul.mubr.bf16.gmra.mxu1 %v3324_v44 }
 0x16b   :  { %2599 = vmatprep.mubr.bf16.mxu1 %v3329_v47 }
 0x172   :  { %2600 = vmatmul.mubr.bf16.gmra.mxu1 %v3335_v51 }
 0x173   :  { %2603 = vmatprep.mubr.bf16.mxu1 %v3339_v24 }
 0x17a   :  { %2604 = vmatmul.mubr.bf16.gmra.mxu1 %v3345_v39 }
 0x17b   :  { %2607 = vmatprep.mubr.bf16.mxu1 %v3349_v42 }
 0x182   :  { %2608 = vmatmul.mubr.bf16.gmra.mxu1 %v3353_v23 }
 0x1ca   :  { %v3356_v57 = vpop.f32.mrf.mxu1 }
 0x1cb   :  { %1118 = vmax.xlane.f32.xlu1 %v3356_v57 }
 0x1cc   :  { %v3359_v59 = vpop.f32.mrf.mxu1 }
 0x1cd   :  { %1114 = vmax.xlane.f32.xlu0 %v3359_v59 }
 0x1ce   :  { %v3362_v52 = vpop.f32.mrf.mxu1 }
 0x1cf   :  { %1120 = vmax.xlane.f32.xlu1 %v3362_v52 }
 0x1d0   :  { %v3365_v54 = vpop.f32.mrf.mxu1 }
 0x1d1   :  { %1116 = vmax.xlane.f32.xlu0 %v3365_v54 }
 0x1d2   :  { %v3368_v4 = vpop.f32.mrf.mxu1 }
 0x1d4   :  { %v3370_v16 = vpop.f32.mrf.mxu1 }
 0x1d5   :  { %1126 = vmax.xlane.f32.xlu0 %v3368_v4 }
 0x1d6   :  { %v3373_v55 = vpop.f32.mrf.mxu1 }
 0x1d7   :  { %1128 = vmax.xlane.f32.xlu1 %v3373_v55 }
 0x1d8   :  { %v3376_v56 = vpop.f32.mrf.mxu1 }
 0x1d9   :  { %1122 = vmax.xlane.f32.xlu0 %v3370_v16 }
 0x1da   :  { %v3379_v1 = vpop.f32.mrf.mxu1 }
 0x1db   :  { %1124 = vmax.xlane.f32.xlu1 %v3376_v56 }
 0x1dc   :  { %v3382_v2 = vpop.f32.mrf.mxu1 }
 0x1dd   :  { %1134 = vmax.xlane.f32.xlu0 %v3379_v1 }
 0x1de   :  { %v3385_v13 = vpop.f32.mrf.mxu1 }
 0x1df   :  { %1136 = vmax.xlane.f32.xlu1 %v3385_v13 }
 0x1e0   :  { %v3388_v3 = vpop.f32.mrf.mxu1 }
 0x1e1   :  { %1130 = vmax.xlane.f32.xlu0 %v3382_v2 }
 0x1e2   :  { %v3391_v63 = vpop.f32.mrf.mxu1 }
 0x1e3   :  { %1132 = vmax.xlane.f32.xlu1 %v3388_v3 }
 0x1e4   :  { %v3394_v9 = vpop.f32.mrf.mxu1 }
 0x1e5   :  { %1142 = vmax.xlane.f32.xlu0 %v3391_v63 }
 0x1e6   :  { %v3397_v8 = vpop.f32.mrf.mxu1 }
 0x1e7   :  { %1144 = vmax.xlane.f32.xlu1 %v3397_v8 }
 0x1e8   :  { %v3400_v32 = vpop.f32.mrf.mxu1 }
 0x1e9   :  { %1138 = vmax.xlane.f32.xlu0 %v3394_v9 }
 0x1ea   :  { %v3403_v48 = vpop.f32.mrf.mxu1 }
 0x1eb   :  { %1140 = vmax.xlane.f32.xlu1 %v3400_v32 }
 0x1ec   :  { %v3406_v15 = vpop.f32.mrf.mxu1 }
 0x1ed   :  { %1150 = vmax.xlane.f32.xlu0 %v3403_v48 }
 0x1ee   :  { %v3409_v19 = vpop.f32.mrf.mxu1 }
 0x1ef   :  { %1152 = vmax.xlane.f32.xlu1 %v3409_v19 }
 0x1f0   :  { %v3412_v20 = vpop.f32.mrf.mxu1 }
 0x1f1   :  { %1146 = vmax.xlane.f32.xlu0 %v3406_v15 }
 0x1f2   :  { %v3415_v43 = vpop.f32.mrf.mxu1 }
 0x1f3   :  { %1148 = vmax.xlane.f32.xlu1 %v3412_v20 }
 0x1f4   :  { %v3418_v61 = vpop.f32.mrf.mxu1 }
 0x1f5   :  { %1158 = vmax.xlane.f32.xlu0 %v3415_v43 }
 0x1f6   :  { %v3421_v25 = vpop.f32.mrf.mxu1 }
 0x1f7   :  { %1160 = vmax.xlane.f32.xlu1 %v3421_v25 }
 0x1f8   :  { %v3424_v40 = vpop.f32.mrf.mxu1 }
 0x1f9   :  { %1154 = vmax.xlane.f32.xlu0 %v3418_v61 }
 0x1fa   :  { %v3427_v12 = vpop.f32.mrf.mxu1 }
 0x1fb   :  { %1156 = vmax.xlane.f32.xlu1 %v3424_v40 }
 0x1fc   :  { %v3430_v33 = vpop.f32.mrf.mxu1 }
 0x1fd   :  { %1166 = vmax.xlane.f32.xlu0 %v3427_v12 }
 0x1fe   :  { %v3433_v28 = vpop.f32.mrf.mxu1 }
 0x1ff   :  { %1168 = vmax.xlane.f32.xlu1 %v3433_v28 }
 0x200   :  { %v3436_v31 = vpop.f32.mrf.mxu1 }
 0x201   :  { %1162 = vmax.xlane.f32.xlu0 %v3430_v33 }
 0x202   :  { %v3439_v17 = vpop.f32.mrf.mxu1 }
 0x203   :  { %1164 = vmax.xlane.f32.xlu1 %v3436_v31 }
 0x204   :  { %v3442_v30 = vpop.f32.mrf.mxu1 }
 0x205   :  { %1174 = vmax.xlane.f32.xlu0 %v3439_v17 }
 0x206   :  { %v3445_v45 = vpop.f32.mrf.mxu1 }
 0x207   :  { %1176 = vmax.xlane.f32.xlu1 %v3445_v45 }
 0x208   :  { %v3448_v0 = vpop.f32.mrf.mxu1 }
 0x209   :  { %1170 = vmax.xlane.f32.xlu0 %v3442_v30 }
 0x20a   :  { %v3451_v23 = vpop.f32.mrf.mxu1 }
 0x20b   :  { %1172 = vmax.xlane.f32.xlu1 %v3448_v0 }
 0x20c   :  { %v3454_v42 = vpop.f32.mrf.mxu1 }
 0x20d   :  { %1182 = vmax.xlane.f32.xlu0 %v3451_v23 }
 0x20e   :  { %v3457_v39 = vpop.f32.mrf.mxu1 }
 0x20f   :  { %1184 = vmax.xlane.f32.xlu1 %v3457_v39 }
 0x210   :  { %v3460_v24 = vpop.f32.mrf.mxu1 }
 0x211   :  { %1178 = vmax.xlane.f32.xlu0 %v3454_v42 }
 0x212   :  { %v3463_v51 = vpop.f32.mrf.mxu1 }
 0x213   :  { %1180 = vmax.xlane.f32.xlu1 %v3460_v24 }
 0x214   :  { %v3466_v47 = vpop.f32.mrf.mxu1 }
 0x215   :  { %1190 = vmax.xlane.f32.xlu0 %v3463_v51 }
 0x216   :  { %v3469_v44 = vpop.f32.mrf.mxu1 }
 0x217   :  { %1192 = vmax.xlane.f32.xlu1 %v3469_v44 }
 0x218   :  { %v3472_v49 = vpop.f32.mrf.mxu1 }
 0x219   :  { %1186 = vmax.xlane.f32.xlu0 %v3466_v47 }
 0x21a   :  { %v3475_v46 = vpop.f32.mrf.mxu1 }
 0x21b   :  { %1188 = vmax.xlane.f32.xlu1 %v3472_v49 }
 0x21c   :  { %v3478_v27 = vpop.f32.mrf.mxu1 }
 0x21d   :  { %1198 = vmax.xlane.f32.xlu0 %v3475_v46 }
 0x21e   :  { %v3481_v26 = vpop.f32.mrf.mxu1 }
 0x21f   :  { %1200 = vmax.xlane.f32.xlu1 %v3481_v26 }
 0x220   :  { %v3484_v11 = vpop.f32.mrf.mxu1 }
 0x221   :  { %1194 = vmax.xlane.f32.xlu0 %v3478_v27 }
 0x222   :  { %v3487_v10 = vpop.f32.mrf.mxu1 }
 0x223   :  { %1196 = vmax.xlane.f32.xlu1 %v3484_v11 }
 0x224   :  { %v3490_v53 = vpop.f32.mrf.mxu1 }
 0x225   :  { %1206 = vmax.xlane.f32.xlu0 %v3487_v10 }
 0x226   :  { %v3493_v50 = vpop.f32.mrf.mxu1 }
 0x227   :  { %1208 = vmax.xlane.f32.xlu1 %v3493_v50 }
 0x228   :  { %v3496_v36 = vpop.f32.mrf.mxu1 }
 0x229   :  { %1202 = vmax.xlane.f32.xlu0 %v3490_v53 }
 0x22a   :  { %v3499_v29 = vpop.f32.mrf.mxu1 }
 0x22b   :  { %4349 = vst [vmem:[#allocation40_spill] sm:$0xff] %v3499_v29  ;;  %1204 = vmax.xlane.f32.xlu1 %v3496_v36 }
 0x22c   :  { %v3502_v34 = vpop.f32.mrf.mxu1 }
 0x22d   :  { %4350 = vst [vmem:[#allocation41_spill] sm:$0xff] %v3502_v34  ;;  %1214 = vmax.xlane.f32.xlu0 %v3499_v29 }
 0x22e   :  { %v3505_v62 = vpop.f32.mrf.mxu1 }
 0x22f   :  { %4351 = vst [vmem:[#allocation42_spill] sm:$0xff] %v3505_v62  ;;  %1216 = vmax.xlane.f32.xlu1 %v3505_v62 }
 0x230   :  { %v3508_v7 = vpop.f32.mrf.mxu1 }
 0x231   :  { %4352 = vst [vmem:[#allocation43_spill] sm:$0xff] %v3508_v7  ;;  %1210 = vmax.xlane.f32.xlu0 %v3502_v34 }
 0x232   :  { %v3511_v35 = vpop.f32.mrf.mxu1 }
 0x233   :  { %4353 = vst [vmem:[#allocation44_spill] sm:$0xff] %v3511_v35  ;;  %1212 = vmax.xlane.f32.xlu1 %v3508_v7 }
 0x234   :  { %v3514_v41 = vpop.f32.mrf.mxu1 }
 0x235   :  { %4354 = vst [vmem:[#allocation45_spill] sm:$0xff] %v3514_v41  ;;  %1222 = vmax.xlane.f32.xlu0 %v3511_v35 }
 0x236   :  { %v3517_v14 = vpop.f32.mrf.mxu1 }
 0x237   :  { %4355 = vst [vmem:[#allocation46_spill] sm:$0xff] %v3517_v14  ;;  %1224 = vmax.xlane.f32.xlu1 %v3517_v14 }
 0x238   :  { %v3520_v18 = vpop.f32.mrf.mxu1 }
 0x239   :  { %4356 = vst [vmem:[#allocation47_spill] sm:$0xff] %v3520_v18  ;;  %1218 = vmax.xlane.f32.xlu0 %v3514_v41 }
 0x23a   :  { %v3523_v58 = vpop.f32.mrf.mxu1 }
 0x23b   :  { %4357 = vst [vmem:[#allocation48_spill] sm:$0xff] %v3523_v58  ;;  %1220 = vmax.xlane.f32.xlu1 %v3520_v18 }
 0x23c   :  { %v3526_v60 = vpop.f32.mrf.mxu1 }
 0x23d   :  { %4358 = vst [vmem:[#allocation49_spill] sm:$0xff] %v3526_v60  ;;  %1230 = vmax.xlane.f32.xlu0 %v3523_v58 }
 0x23e   :  { %v3529_v37 = vpop.f32.mrf.mxu1 }
 0x23f   :  { %4359 = vst [vmem:[#allocation50_spill] sm:$0xff] %v3529_v37  ;;  %1232 = vmax.xlane.f32.xlu1 %v3529_v37 }
 0x240   :  { %v3532_v38 = vpop.f32.mrf.mxu1 }
 0x241   :  { %4360 = vst [vmem:[#allocation51_spill] sm:$0xff] %v3532_v38  ;;  %1226 = vmax.xlane.f32.xlu0 %v3526_v60 }
 0x242   :  { %v3535_v21 = vpop.f32.mrf.mxu1 }
 0x243   :  { %1228 = vmax.xlane.f32.xlu1 %v3532_v38 }
 0x244   :  { %v3538_v22 = vpop.f32.mrf.mxu1 }
 0x245   :  { %4361 = vst [vmem:[#allocation52_spill] sm:$0xff] %v3538_v22  ;;  %1234 = vmax.xlane.f32.xlu0 %v3538_v22 }
 0x246   :  { %v3541_v5 = vpop.f32.mrf.mxu1 }
 0x248   :  { %v3543_v6 = vpop.f32.mrf.mxu1 }
 0x249   :  { %4362 = vst [vmem:[#allocation53_spill] sm:$0xff] %v3543_v6  ;;  %1236 = vmax.xlane.f32.xlu1 %v3543_v6 }
 0x254   :  { %v1119_v58 = vpop.xlane.xlu1 %1118 }
 0x255   :  { %v1244_v37 = vsub.f32 %v3356_v57, %v1119_v58 }
 0x256   :  { %v1115_v18 = vpop.xlane.xlu0 %1114 }
 0x257   :  { %v1310_v14 = vmul.f32 1.442695, %v1244_v37  ;;  %v1242_v60 = vsub.f32 %v3359_v59, %v1115_v18 }
 0x258   :  { %v1121_v41 = vpop.xlane.xlu1 %1120 }
 0x259   :  { %2767 = vpow2.f32 %v1310_v14  ;;  %v1306_v38 = vmul.f32 1.442695, %v1242_v60  ;;  %v1245_v35 = vsub.f32 %v3362_v52, %v1121_v41 }
 0x25a   :  { %v1117_v7 = vpop.xlane.xlu0 %1116 }
 0x25b   :  { %v1312_v22 = vmul.f32 1.442695, %v1245_v35  ;;  %v1243_v62 = vsub.f32 %v3365_v54, %v1117_v7  ;;  %2769 = vpow2.f32 %v1306_v38 }
 0x25d   :  { %2771 = vpow2.f32 %v1312_v22  ;;  %v1308_v34 = vmul.f32 1.442695, %v1243_v62 }
 0x25e   :  { %v1127_v6 = vpop.xlane.xlu0 %1126 }
 0x25f   :  { %v1248_v29 = vsub.f32 %v3368_v4, %v1127_v6  ;;  %2773 = vpow2.f32 %v1308_v34 }
 0x260   :  { %v1129_v58 = vpop.xlane.xlu1 %1128 }
 0x261   :  { %v1318_v37 = vmul.f32 1.442695, %v1248_v29  ;;  %v1249_v18 = vsub.f32 %v3373_v55, %v1129_v58  ;;  %v2759_v29 = vld [vmem:[%s4216_s4 + $0x38] sm:$0xff]  }
 0x262   :  { %v1123_v57 = vpop.xlane.xlu0 %1122  ;;  %2611 = vmatprep.subr.bf16.mxu0 %v2759_v29 }
 0x263   :  { %2775 = vpow2.f32 %v1318_v37  ;;  %v1320_v60 = vmul.f32 1.442695, %v1249_v18  ;;  %v1246_v14 = vsub.f32 %v3370_v16, %v1123_v57  ;;  %2612 = vmatpush3.bf16.msra.mxu0 %v2759_v29 }
 0x264   :  { %v1125_v41 = vpop.xlane.xlu1 %1124 }
 0x265   :  { %2777 = vpow2.f32 %v1320_v60  ;;  %v1314_v35 = vmul.f32 1.442695, %v1246_v14  ;;  %v1247_v38 = vsub.f32 %v3376_v56, %v1125_v41 }
 0x266   :  { %v3554_v22 = vpop.eup %2767  ;;  %v1135_v62 = vpop.xlane.xlu0 %1134 }
 0x267   :  { %2779 = vpow2.f32 %v1314_v35  ;;  %v1316_v6 = vmul.f32 1.442695, %v1247_v38  ;;  %v1252_v7 = vsub.f32 %v3379_v1, %v1135_v62  ;;  %1438 = vadd.xlane.f32.xlu0 %v3554_v22 }
 0x268   :  { %v1137_v34 = vpop.xlane.xlu1 %1136  ;;  %v3561_v59 = vpop.eup %2769 }
 0x269   :  { %2781 = vpow2.f32 %v1316_v6  ;;  %v1326_v52 = vmul.f32 1.442695, %v1252_v7  ;;  %v1253_v54 = vsub.f32 %v3385_v13, %v1137_v34 }
 0x26a   :  { %v3564_v4 = vpop.eup %2771  ;;  %v1131_v16 = vpop.xlane.xlu0 %1130 }
 0x26b   :  { %2783 = vpow2.f32 %v1326_v52  ;;  %v1328_v55 = vmul.f32 1.442695, %v1253_v54  ;;  %v1250_v56 = vsub.f32 %v3382_v2, %v1131_v16  ;;  %1434 = vadd.xlane.f32.xlu0 %v3561_v59  ;;  %1440 = vadd.xlane.f32.xlu1 %v3564_v4  ;;  %v2761_v52 = vld [vmem:[%s4216_s4 + $0x28] sm:$0xff]  }
 0x26c   :  { %v1133_v1 = vpop.xlane.xlu1 %1132  ;;  %v3570_v18 = vpop.eup %2773 }
 0x26d   :  { %2785 = vpow2.f32 %v1328_v55  ;;  %v1322_v58 = vmul.f32 1.442695, %v1250_v56  ;;  %v1251_v37 = vsub.f32 %v3388_v3, %v1133_v1  ;;  %v2760_v3 = vld [vmem:[%s4216_s4 + $0x30] sm:$0xff]  }
 0x26e   :  { %v1143_v13 = vpop.xlane.xlu0 %1142  ;;  %2613 = vmatprep.subr.bf16.mxu0 %v2760_v3 }
 0x26f   :  { %2787 = vpow2.f32 %v1322_v58  ;;  %v1324_v57 = vmul.f32 1.442695, %v1251_v37  ;;  %v1256_v60 = vsub.f32 %v3391_v63, %v1143_v13  ;;  %1436 = vadd.xlane.f32.xlu1 %v3570_v18  ;;  %2614 = vmatpush3.bf16.msra.mxu0 %v2760_v3 }
 0x270   :  { %v3574_v14 = vpop.eup %2775  ;;  %v1145_v2 = vpop.xlane.xlu1 %1144  ;;  %2615 = vmatprep.subr.bf16.mxu0 %v2761_v52 }
 0x271   :  { %2789 = vpow2.f32 %v1324_v57  ;;  %v1334_v41 = vmul.f32 1.442695, %v1256_v60  ;;  %v1257_v35 = vsub.f32 %v3397_v8, %v1145_v2  ;;  %1446 = vadd.xlane.f32.xlu0 %v3574_v14 }
 0x272   :  { %v3581_v38 = vpop.eup %2777  ;;  %v1139_v62 = vpop.xlane.xlu0 %1138 }
 0x273   :  { %2791 = vpow2.f32 %v1334_v41  ;;  %v1336_v63 = vmul.f32 1.442695, %v1257_v35  ;;  %v1254_v6 = vsub.f32 %v3394_v9, %v1139_v62  ;;  %1448 = vadd.xlane.f32.xlu1 %v3581_v38  ;;  %2616 = vmatpush3.bf16.msra.mxu0 %v2761_v52 }
 0x274   :  { %v3585_v7 = vpop.eup %2779  ;;  %v1141_v29 = vpop.xlane.xlu1 %1140 }
 0x275   :  { %2793 = vpow2.f32 %v1336_v63  ;;  %v1330_v8 = vmul.f32 1.442695, %v1254_v6  ;;  %v1255_v34 = vsub.f32 %v3400_v32, %v1141_v29  ;;  %1442 = vadd.xlane.f32.xlu0 %v3585_v7  ;;  %v2762_v32 = vld [vmem:[%s4216_s4 + $0x20] sm:$0xff]   ;;  %v2764_v29 = vld [vmem:[%s4216_s4 + $0x10] sm:$0xff]  }
 0x276   :  { %v3592_v54 = vpop.eup %2781  ;;  %v1151_v9 = vpop.xlane.xlu0 %1150  ;;  %2617 = vmatprep.subr.bf16.mxu0 %v2762_v32 }
 0x277   :  { %2795 = vpow2.f32 %v1330_v8  ;;  %v1332_v16 = vmul.f32 1.442695, %v1255_v34  ;;  %1444 = vadd.xlane.f32.xlu1 %v3592_v54  ;;  %v1260_v37 = vsub.f32 %v3403_v48, %v1151_v9  ;;  %2618 = vmatpush3.bf16.msra.mxu0 %v2762_v32  ;;  %v2763_v48 = vld [vmem:[%s4216_s4 + $0x18] sm:$0xff]  }
 0x278   :  { %v3595_v55 = vpop.eup %2783  ;;  %v1153_v56 = vpop.xlane.xlu1 %1152  ;;  %2619 = vmatprep.subr.bf16.mxu0 %v2763_v48 }
 0x279   :  { %2797 = vpow2.f32 %v1332_v16  ;;  %1454 = vadd.xlane.f32.xlu0 %v3595_v55  ;;  %v1261_v2 = vsub.f32 %v3409_v19, %v1153_v56  ;;  %v1342_v62 = vmul.f32 1.442695, %v1260_v37 }
 0x27a   :  { %v3601_v1 = vpop.eup %2785  ;;  %v1147_v58 = vpop.xlane.xlu0 %1146 }
 0x27b   :  { %v1258_v13 = vsub.f32 %v3406_v15, %v1147_v58  ;;  %1456 = vadd.xlane.f32.xlu1 %v3601_v1  ;;  %2620 = vmatpush3.bf16.msra.mxu0 %v2763_v48 }
 0x27c   :  { %v3606_v57 = vpop.eup %2787  ;;  %v1149_v60 = vpop.xlane.xlu1 %1148  ;;  %2621 = vmatprep.subr.bf16.mxu0 %v2764_v29 }
 0x27d   :  { %v1338_v41 = vmul.f32 1.442695, %v1258_v13  ;;  %v1259_v35 = vsub.f32 %v3412_v20, %v1149_v60  ;;  %1450 = vadd.xlane.f32.xlu0 %v3606_v57  ;;  %v1344_v20 = vmul.f32 1.442695, %v1261_v2 }
 0x27e   :  { %v3614_v3 = vpop.eup %2789  ;;  %v1159_v15 = vpop.xlane.xlu0 %1158 }
 0x27f   :  { %2799 = vpow2.f32 %v1338_v41  ;;  %v1340_v63 = vmul.f32 1.442695, %v1259_v35  ;;  %1452 = vadd.xlane.f32.xlu1 %v3614_v3  ;;  %v1264_v52 = vsub.f32 %v3415_v43, %v1159_v15  ;;  %2622 = vmatpush3.bf16.msra.mxu0 %v2764_v29  ;;  %v2765_v43 = vld [vmem:[%s4216_s4 + $0x8] sm:$0xff]  }
 0x280   :  { %v3617_v6 = vpop.eup %2791  ;;  %v1161_v19 = vpop.xlane.xlu1 %1160  ;;  %2623 = vmatprep.subr.bf16.mxu0 %v2765_v43 }
 0x281   :  { %2801 = vpow2.f32 %v1340_v63  ;;  %1462 = vadd.xlane.f32.xlu0 %v3617_v6  ;;  %v1265_v32 = vsub.f32 %v3421_v25, %v1161_v19  ;;  %v1350_v60 = vmul.f32 1.442695, %v1264_v52 }
 0x282   :  { %v3623_v8 = vpop.eup %2793  ;;  %v1155_v34 = vpop.xlane.xlu0 %1154  ;;  %2803 = vpow2.f32 %v1342_v62 }
 0x283   :  { %v1262_v9 = vsub.f32 %v3418_v61, %v1155_v34  ;;  %1464 = vadd.xlane.f32.xlu1 %v3623_v8  ;;  %2805 = vpow2.f32 %v1344_v20  ;;  %2624 = vmatpush3.bf16.msra.mxu0 %v2765_v43  ;;  %v1352_v25 = vmul.f32 1.442695, %v1265_v32 }
 0x284   :  { %v3628_v16 = vpop.eup %2795  ;;  %v1157_v56 = vpop.xlane.xlu1 %1156 }
 0x285   :  { %v1346_v58 = vmul.f32 1.442695, %v1262_v9  ;;  %v1263_v37 = vsub.f32 %v3424_v40, %v1157_v56  ;;  %1458 = vadd.xlane.f32.xlu0 %v3628_v16  ;;  %v2766_v40 = vld [vmem:[%s4216_s4] sm:$0xff]  }
 0x286   :  { %v3636_v61 = vpop.eup %2797  ;;  %v1167_v13 = vpop.xlane.xlu0 %1166  ;;  %2625 = vmatprep.subr.bf16.mxu0 %v2766_v40 }
 0x287   :  { %2807 = vpow2.f32 %v1346_v58  ;;  %v1348_v2 = vmul.f32 1.442695, %v1263_v37  ;;  %1460 = vadd.xlane.f32.xlu1 %v3636_v61  ;;  %v1268_v48 = vsub.f32 %v3427_v12, %v1167_v13  ;;  %2626 = vmatpush3.bf16.msra.mxu0 %v2766_v40 }
 0x288   :  { %v1169_v41 = vpop.xlane.xlu1 %1168 }
 0x289   :  { %2809 = vpow2.f32 %v1348_v2  ;;  %1238 = vmax.xlane.f32.xlu0 %v3535_v21  ;;  %v1269_v19 = vsub.f32 %v3433_v28, %v1169_v41  ;;  %v1358_v52 = vmul.f32 1.442695, %v1268_v48 }
 0x28a   :  { %v1163_v35 = vpop.xlane.xlu0 %1162  ;;  %2811 = vpow2.f32 %v1350_v60 }
 0x28b   :  { %v1266_v15 = vsub.f32 %v3430_v33, %v1163_v35  ;;  %1240 = vmax.xlane.f32.xlu1 %v3541_v5  ;;  %2813 = vpow2.f32 %v1352_v25  ;;  %v1360_v32 = vmul.f32 1.442695, %v1269_v19 }
 0x28c   :  { %v3646_v62 = vpop.eup %2799  ;;  %v1165_v63 = vpop.xlane.xlu1 %1164 }
 0x28d   :  { %v1354_v20 = vmul.f32 1.442695, %v1266_v15  ;;  %v1267_v29 = vsub.f32 %v3436_v31, %v1165_v63  ;;  %1466 = vadd.xlane.f32.xlu0 %v3646_v62 }
 0x28e   :  { %v3651_v34 = vpop.eup %2801  ;;  %v1175_v12 = vpop.xlane.xlu0 %1174 }
 0x28f   :  { %2815 = vpow2.f32 %v1354_v20  ;;  %v1356_v33 = vmul.f32 1.442695, %v1267_v29  ;;  %1468 = vadd.xlane.f32.xlu1 %v3651_v34  ;;  %v3654_v9 = vpop.eup %2803  ;;  %v1272_v58 = vsub.f32 %v3439_v17, %v1175_v12 }
 0x290   :  { %v1177_v56 = vpop.xlane.xlu1 %1176  ;;  %v3657_v28 = vpop.eup %2805 }
 0x291   :  { %2817 = vpow2.f32 %v1356_v33  ;;  %1470 = vadd.xlane.f32.xlu0 %v3654_v9  ;;  %v1273_v60 = vsub.f32 %v3445_v45, %v1177_v56  ;;  %v1366_v35 = vmul.f32 1.442695, %v1272_v58 }
 0x292   :  { %v1171_v31 = vpop.xlane.xlu0 %1170  ;;  %2819 = vpow2.f32 %v1358_v52 }
 0x293   :  { %v1270_v37 = vsub.f32 %v3442_v30, %v1171_v31  ;;  %1472 = vadd.xlane.f32.xlu1 %v3657_v28  ;;  %2821 = vpow2.f32 %v1360_v32  ;;  %v1368_v15 = vmul.f32 1.442695, %v1273_v60 }
 0x294   :  { %v3662_v43 = vpop.eup %2807  ;;  %v1173_v13 = vpop.xlane.xlu1 %1172 }
 0x295   :  { %v1362_v2 = vmul.f32 1.442695, %v1270_v37  ;;  %v1271_v41 = vsub.f32 %v3448_v0, %v1173_v13  ;;  %1474 = vadd.xlane.f32.xlu0 %v3662_v43 }
 0x296   :  { %v3667_v25 = vpop.eup %2809  ;;  %v1183_v40 = vpop.xlane.xlu0 %1182 }
 0x297   :  { %2823 = vpow2.f32 %v1362_v2  ;;  %v1364_v17 = vmul.f32 1.442695, %v1271_v41  ;;  %1476 = vadd.xlane.f32.xlu1 %v3667_v25  ;;  %v3670_v30 = vpop.eup %2811  ;;  %v1276_v63 = vsub.f32 %v3451_v23, %v1183_v40 }
 0x298   :  { %v1185_v48 = vpop.xlane.xlu1 %1184  ;;  %v3673_v45 = vpop.eup %2813 }
 0x299   :  { %2825 = vpow2.f32 %v1364_v17  ;;  %1478 = vadd.xlane.f32.xlu0 %v3670_v30  ;;  %v1277_v12 = vsub.f32 %v3457_v39, %v1185_v48  ;;  %v1374_v31 = vmul.f32 1.442695, %v1276_v63 }
 0x29a   :  { %v1179_v0 = vpop.xlane.xlu0 %1178  ;;  %2827 = vpow2.f32 %v1366_v35 }
 0x29b   :  { %v1274_v19 = vsub.f32 %v3454_v42, %v1179_v0  ;;  %1480 = vadd.xlane.f32.xlu1 %v3673_v45  ;;  %2829 = vpow2.f32 %v1368_v15  ;;  %v1376_v37 = vmul.f32 1.442695, %v1277_v12 }
 0x29c   :  { %v3678_v20 = vpop.eup %2815  ;;  %v1181_v29 = vpop.xlane.xlu1 %1180 }
 0x29d   :  { %v1370_v52 = vmul.f32 1.442695, %v1274_v19  ;;  %v1275_v33 = vsub.f32 %v3460_v24, %v1181_v29  ;;  %1482 = vadd.xlane.f32.xlu0 %v3678_v20 }
 0x29e   :  { %v3683_v56 = vpop.eup %2817  ;;  %v1191_v32 = vpop.xlane.xlu0 %1190 }
 0x29f   :  { %2831 = vpow2.f32 %v1370_v52  ;;  %v1372_v23 = vmul.f32 1.442695, %v1275_v33  ;;  %1484 = vadd.xlane.f32.xlu1 %v3683_v56  ;;  %v3686_v42 = vpop.eup %2819  ;;  %v1280_v13 = vsub.f32 %v3463_v51, %v1191_v32 }
 0x2a0   :  { %v1193_v58 = vpop.xlane.xlu1 %1192  ;;  %v3689_v39 = vpop.eup %2821 }
 0x2a1   :  { %2833 = vpow2.f32 %v1372_v23  ;;  %1486 = vadd.xlane.f32.xlu0 %v3686_v42  ;;  %v1281_v40 = vsub.f32 %v3469_v44, %v1193_v58  ;;  %v1382_v0 = vmul.f32 1.442695, %v1280_v13 }
 0x2a2   :  { %v1187_v24 = vpop.xlane.xlu0 %1186  ;;  %2835 = vpow2.f32 %v1374_v31 }
 0x2a3   :  { %v1278_v60 = vsub.f32 %v3466_v47, %v1187_v24  ;;  %1488 = vadd.xlane.f32.xlu1 %v3689_v39  ;;  %2837 = vpow2.f32 %v1376_v37  ;;  %v1384_v19 = vmul.f32 1.442695, %v1281_v40 }
 0x2a4   :  { %v3694_v2 = vpop.eup %2823  ;;  %v1189_v41 = vpop.xlane.xlu1 %1188 }
 0x2a5   :  { %v1378_v35 = vmul.f32 1.442695, %v1278_v60  ;;  %v1279_v17 = vsub.f32 %v3472_v49, %v1189_v41  ;;  %1490 = vadd.xlane.f32.xlu0 %v3694_v2 }
 0x2a6   :  { %v3699_v48 = vpop.eup %2825  ;;  %v1199_v15 = vpop.xlane.xlu0 %1198 }
 0x2a7   :  { %2839 = vpow2.f32 %v1378_v35  ;;  %v1380_v51 = vmul.f32 1.442695, %v1279_v17  ;;  %1492 = vadd.xlane.f32.xlu1 %v3699_v48  ;;  %v3702_v47 = vpop.eup %2827  ;;  %v1284_v29 = vsub.f32 %v3475_v46, %v1199_v15 }
 0x2a8   :  { %v1201_v63 = vpop.xlane.xlu1 %1200  ;;  %v3705_v44 = vpop.eup %2829 }
 0x2a9   :  { %2841 = vpow2.f32 %v1380_v51  ;;  %1494 = vadd.xlane.f32.xlu0 %v3702_v47  ;;  %v1285_v32 = vsub.f32 %v3481_v26, %v1201_v63  ;;  %v1390_v24 = vmul.f32 1.442695, %v1284_v29 }
 0x2aa   :  { %v1195_v49 = vpop.xlane.xlu0 %1194  ;;  %2843 = vpow2.f32 %v1382_v0 }
 0x2ab   :  { %v1282_v12 = vsub.f32 %v3478_v27, %v1195_v49  ;;  %1496 = vadd.xlane.f32.xlu1 %v3705_v44  ;;  %2845 = vpow2.f32 %v1384_v19  ;;  %v1392_v60 = vmul.f32 1.442695, %v1285_v32 }
 0x2ac   :  { %v3710_v52 = vpop.eup %2831  ;;  %v1197_v33 = vpop.xlane.xlu1 %1196 }
 0x2ad   :  { %v1386_v31 = vmul.f32 1.442695, %v1282_v12  ;;  %v1283_v23 = vsub.f32 %v3484_v11, %v1197_v33  ;;  %1498 = vadd.xlane.f32.xlu0 %v3710_v52  ;;  %v4363_v33 = vld [vmem:[#allocation40_spill] sm:$0xff] }
 0x2ae   :  { %v3715_v58 = vpop.eup %2833  ;;  %v1207_v37 = vpop.xlane.xlu0 %1206 }
 0x2af   :  { %2847 = vpow2.f32 %v1386_v31  ;;  %v1388_v46 = vmul.f32 1.442695, %v1283_v23  ;;  %1500 = vadd.xlane.f32.xlu1 %v3715_v58  ;;  %v3718_v27 = vpop.eup %2835  ;;  %v1288_v41 = vsub.f32 %v3487_v10, %v1207_v37  ;;  %v4364_v31 = vld [vmem:[#allocation41_spill] sm:$0xff] }
 0x2b0   :  { %v1209_v13 = vpop.xlane.xlu1 %1208  ;;  %v3721_v26 = vpop.eup %2837 }
 0x2b1   :  { %2849 = vpow2.f32 %v1388_v46  ;;  %1502 = vadd.xlane.f32.xlu0 %v3718_v27  ;;  %v1289_v15 = vsub.f32 %v3493_v50, %v1209_v13  ;;  %v1398_v49 = vmul.f32 1.442695, %v1288_v41  ;;  %v4365_v46 = vld [vmem:[#allocation42_spill] sm:$0xff] }
 0x2b2   :  { %v1203_v11 = vpop.xlane.xlu0 %1202  ;;  %2851 = vpow2.f32 %v1390_v24 }
 0x2b3   :  { %v1286_v40 = vsub.f32 %v3490_v53, %v1203_v11  ;;  %1504 = vadd.xlane.f32.xlu1 %v3721_v26  ;;  %2853 = vpow2.f32 %v1392_v60  ;;  %v1400_v12 = vmul.f32 1.442695, %v1289_v15  ;;  %v4366_v11 = vld [vmem:[#allocation43_spill] sm:$0xff] }
 0x2b4   :  { %v3726_v35 = vpop.eup %2839  ;;  %v1205_v17 = vpop.xlane.xlu1 %1204 }
 0x2b5   :  { %v1394_v0 = vmul.f32 1.442695, %v1286_v40  ;;  %v1287_v51 = vsub.f32 %v3496_v36, %v1205_v17  ;;  %1506 = vadd.xlane.f32.xlu0 %v3726_v35 }
 0x2b6   :  { %v3731_v63 = vpop.eup %2841  ;;  %v1215_v19 = vpop.xlane.xlu0 %1214 }
 0x2b7   :  { %2855 = vpow2.f32 %v1394_v0  ;;  %v1396_v10 = vmul.f32 1.442695, %v1287_v51  ;;  %1508 = vadd.xlane.f32.xlu1 %v3731_v63  ;;  %v3734_v53 = vpop.eup %2843  ;;  %v1292_v32 = vsub.f32 %v4363_v33, %v1215_v19  ;;  %v4371_v33 = vld [vmem:[#allocation45_spill] sm:$0xff] }
 0x2b8   :  { %v1217_v29 = vpop.xlane.xlu1 %1216  ;;  %v3737_v50 = vpop.eup %2845 }
 0x2b9   :  { %2857 = vpow2.f32 %v1396_v10  ;;  %1510 = vadd.xlane.f32.xlu0 %v3734_v53  ;;  %v1293_v13 = vsub.f32 %v4365_v46, %v1217_v29  ;;  %v1406_v15 = vmul.f32 1.442695, %v1292_v32 }
 0x2ba   :  { %v1211_v36 = vpop.xlane.xlu0 %1210  ;;  %2859 = vpow2.f32 %v1398_v49 }
 0x2bb   :  { %v1290_v23 = vsub.f32 %v4364_v31, %v1211_v36  ;;  %1512 = vadd.xlane.f32.xlu1 %v3737_v50  ;;  %2861 = vpow2.f32 %v1400_v12  ;;  %v1408_v49 = vmul.f32 1.442695, %v1293_v13  ;;  %v4370_v12 = vld [vmem:[#allocation44_spill] sm:$0xff] }
 0x2bc   :  { %v3742_v37 = vpop.eup %2847  ;;  %v1213_v24 = vpop.xlane.xlu1 %1212 }
 0x2bd   :  { %v1402_v60 = vmul.f32 1.442695, %v1290_v23  ;;  %v1291_v41 = vsub.f32 %v4366_v11, %v1213_v24  ;;  %1514 = vadd.xlane.f32.xlu0 %v3742_v37  ;;  %v4373_v24 = vld [vmem:[#allocation46_spill] sm:$0xff] }
 0x2be   :  { %v3747_v40 = vpop.eup %2849  ;;  %v1223_v17 = vpop.xlane.xlu0 %1222 }
 0x2bf   :  { %4367 = vst [vmem:[#allocation40_spill] sm:$0xff] %v3747_v40  ;;  %2863 = vpow2.f32 %v1402_v60  ;;  %v1404_v0 = vmul.f32 1.442695, %v1291_v41  ;;  %1516 = vadd.xlane.f32.xlu1 %v3747_v40  ;;  %v3750_v51 = vpop.eup %2851  ;;  %v1296_v36 = vsub.f32 %v4370_v12, %v1223_v17  ;;  %v4374_v60 = vld [vmem:[#allocation47_spill] sm:$0xff] }
 0x2c0   :  { %4368 = vst [vmem:[#allocation41_spill] sm:$0xff] %v3750_v51  ;;  %v1225_v19 = vpop.xlane.xlu1 %1224  ;;  %v3753_v10 = vpop.eup %2853 }
 0x2c1   :  { %2865 = vpow2.f32 %v1404_v0  ;;  %1518 = vadd.xlane.f32.xlu0 %v3750_v51  ;;  %4369 = vst [vmem:[#allocation42_spill] sm:$0xff] %v3753_v10  ;;  %v1297_v46 = vsub.f32 %v4373_v24, %v1225_v19  ;;  %v1414_v0 = vmul.f32 1.442695, %v1296_v36  ;;  %v4379_v24 = vld [vmem:[#allocation49_spill] sm:$0xff] }
 0x2c2   :  { %v1219_v29 = vpop.xlane.xlu0 %1218  ;;  %2867 = vpow2.f32 %v1406_v15 }
 0x2c3   :  { %v1294_v31 = vsub.f32 %v4371_v33, %v1219_v29  ;;  %1520 = vadd.xlane.f32.xlu1 %v3753_v10  ;;  %2869 = vpow2.f32 %v1408_v49  ;;  %v1416_v33 = vmul.f32 1.442695, %v1297_v46 }
 0x2c4   :  { %v3758_v32 = vpop.eup %2855  ;;  %v1221_v23 = vpop.xlane.xlu1 %1220 }
 0x2c5   :  { %4372 = vst [vmem:[#allocation43_spill] sm:$0xff] %v3758_v32  ;;  %v1410_v13 = vmul.f32 1.442695, %v1294_v31  ;;  %v1295_v11 = vsub.f32 %v4374_v60, %v1221_v23  ;;  %1522 = vadd.xlane.f32.xlu0 %v3758_v32  ;;  %v4378_v31 = vld [vmem:[#allocation48_spill] sm:$0xff] }
 0x2c6   :  { %v3763_v41 = vpop.eup %2857  ;;  %v1231_v15 = vpop.xlane.xlu0 %1230 }
 0x2c7   :  { %4375 = vst [vmem:[#allocation44_spill] sm:$0xff] %v3763_v41  ;;  %2871 = vpow2.f32 %v1410_v13  ;;  %v1412_v17 = vmul.f32 1.442695, %v1295_v11  ;;  %1524 = vadd.xlane.f32.xlu1 %v3763_v41  ;;  %v3766_v29 = vpop.eup %2859  ;;  %v1300_v23 = vsub.f32 %v4378_v31, %v1231_v15  ;;  %v4381_v11 = vld [vmem:[#allocation50_spill] sm:$0xff] }
 0x2c8   :  { %4376 = vst [vmem:[#allocation45_spill] sm:$0xff] %v3766_v29  ;;  %v1233_v12 = vpop.xlane.xlu1 %1232  ;;  %v3769_v19 = vpop.eup %2861 }
 0x2c9   :  { %2873 = vpow2.f32 %v1412_v17  ;;  %1526 = vadd.xlane.f32.xlu0 %v3766_v29  ;;  %4377 = vst [vmem:[#allocation46_spill] sm:$0xff] %v3769_v19  ;;  %v1301_v41 = vsub.f32 %v4381_v11, %v1233_v12  ;;  %v4382_v17 = vld [vmem:[#allocation51_spill] sm:$0xff]  ;;  %v1422_v10 = vmul.f32 1.442695, %v1300_v23  ;;  %v4387_v11 = vld [vmem:[#allocation53_spill] sm:$0xff] }
 0x2ca   :  { %v1227_v49 = vpop.xlane.xlu0 %1226  ;;  %2875 = vpow2.f32 %v1414_v0 }
 0x2cb   :  { %v1298_v60 = vsub.f32 %v4379_v24, %v1227_v49  ;;  %1528 = vadd.xlane.f32.xlu1 %v3769_v19  ;;  %2877 = vpow2.f32 %v1416_v33  ;;  %v4384_v49 = vld [vmem:[#allocation52_spill] sm:$0xff]  ;;  %v1424_v33 = vmul.f32 1.442695, %v1301_v41 }
 0x2cc   :  { %v3774_v36 = vpop.eup %2863  ;;  %v1229_v13 = vpop.xlane.xlu1 %1228 }
 0x2cd   :  { %4380 = vst [vmem:[#allocation47_spill] sm:$0xff] %v3774_v36  ;;  %v1418_v46 = vmul.f32 1.442695, %v1298_v60  ;;  %v1299_v32 = vsub.f32 %v4382_v17, %v1229_v13  ;;  %1530 = vadd.xlane.f32.xlu0 %v3774_v36 }
 0x2ce   :  { %v3779_v29 = vpop.eup %2865  ;;  %v1235_v0 = vpop.xlane.xlu0 %1234 }
 0x2cf   :  { %4383 = vst [vmem:[#allocation48_spill] sm:$0xff] %v3779_v29  ;;  %2879 = vpow2.f32 %v1418_v46  ;;  %v1420_v15 = vmul.f32 1.442695, %v1299_v32  ;;  %v1302_v31 = vsub.f32 %v4384_v49, %v1235_v0  ;;  %1532 = vadd.xlane.f32.xlu1 %v3779_v29  ;;  %v3783_v24 = vpop.eup %2867 }
 0x2d0   :  { %4385 = vst [vmem:[#allocation49_spill] sm:$0xff] %v3783_v24  ;;  %v3786_v12 = vpop.eup %2869 }
 0x2d1   :  { %2881 = vpow2.f32 %v1420_v15  ;;  %1534 = vadd.xlane.f32.xlu0 %v3783_v24  ;;  %4386 = vst [vmem:[#allocation50_spill] sm:$0xff] %v3786_v12  ;;  %v1426_v13 = vmul.f32 1.442695, %v1302_v31 }
 0x2d2   :  { %v1237_v60 = vpop.xlane.xlu1 %1236  ;;  %2883 = vpow2.f32 %v1422_v10 }
 0x2d3   :  { %v1303_v17 = vsub.f32 %v4387_v11, %v1237_v60  ;;  %1536 = vadd.xlane.f32.xlu1 %v3786_v12  ;;  %2885 = vpow2.f32 %v1424_v33 }
 0x2d4   :  { %v3790_v32 = vpop.eup %2871  ;;  %2887 = vpow2.f32 %v1426_v13 }
 0x2d5   :  { %4388 = vst [vmem:[#allocation51_spill] sm:$0xff] %v3790_v32  ;;  %v1428_v23 = vmul.f32 1.442695, %v1303_v17  ;;  %1538 = vadd.xlane.f32.xlu0 %v3790_v32 }
 0x2d6   :  { %v3793_v46 = vpop.eup %2873 }
 0x2d7   :  { %4389 = vst [vmem:[#allocation52_spill] sm:$0xff] %v3793_v46  ;;  %1540 = vadd.xlane.f32.xlu1 %v3793_v46  ;;  %v3796_v41 = vpop.eup %2875  ;;  %2889 = vpow2.f32 %v1428_v23 }
 0x2d8   :  { %4390 = vst [vmem:[#allocation53_spill] sm:$0xff] %v3796_v41  ;;  %v3799_v10 = vpop.eup %2877 }
 0x2d9   :  { %1542 = vadd.xlane.f32.xlu0 %v3796_v41  ;;  %4391 = vst [vmem:[#allocation54_spill] sm:$0xff] %v3799_v10 }
 0x2db   :  { %1544 = vadd.xlane.f32.xlu1 %v3799_v10 }
 0x2dc   :  { %v3802_v0 = vpop.eup %2879 }
 0x2dd   :  { %4392 = vst [vmem:[#allocation55_spill] sm:$0xff] %v3802_v0  ;;  %1546 = vadd.xlane.f32.xlu0 %v3802_v0 }
 0x2de   :  { %v3805_v15 = vpop.eup %2881 }
 0x2df   :  { %4393 = vst [vmem:[#allocation56_spill] sm:$0xff] %v3805_v15  ;;  %1548 = vadd.xlane.f32.xlu1 %v3805_v15  ;;  %v3808_v49 = vpop.eup %2883 }
 0x2e0   :  { %4394 = vst [vmem:[#allocation57_spill] sm:$0xff] %v3808_v49  ;;  %v3811_v31 = vpop.eup %2885 }
 0x2e1   :  { %1550 = vadd.xlane.f32.xlu0 %v3808_v49  ;;  %4395 = vst [vmem:[#allocation58_spill] sm:$0xff] %v3811_v31  ;;  %v3814_v33 = vpop.eup %2887 }
 0x2e2   :  { %4396 = vst [vmem:[#allocation59_spill] sm:$0xff] %v3814_v33 }
 0x2e3   :  { %1552 = vadd.xlane.f32.xlu1 %v3811_v31 }
 0x2e4   :  { %v3817_v60 = vpop.eup %2889 }
 0x2e5   :  { %1554 = vadd.xlane.f32.xlu0 %v3814_v33  ;;  %4397 = vst [vmem:[#allocation60_spill] sm:$0xff] %v3817_v60 }
 0x2e7   :  { %1556 = vadd.xlane.f32.xlu1 %v3817_v60 }
 0x2f0   :  { %v1439_v13 = vpop.xlane.xlu0 %1438 }
 0x2f1   :  { %2891 = vrcp.f32 %v1439_v13 }
 0x2f4   :  { %v1435_v11 = vpop.xlane.xlu0 %1434  ;;  %v1441_v17 = vpop.xlane.xlu1 %1440 }
 0x2f5   :  { %2893 = vrcp.f32 %v1435_v11 }
 0x2f6   :  { %2895 = vrcp.f32 %v1441_v17 }
 0x2f8   :  { %v1437_v23 = vpop.xlane.xlu1 %1436 }
 0x2f9   :  { %2897 = vrcp.f32 %v1437_v23  ;;  %v4398_v23 = vld [vmem:[#allocation9_spill] sm:$0xff] }
 0x2fa   :  { %v1447_v49 = vpop.xlane.xlu0 %1446  ;;  %v1693_v32 = vunpack.c.h.bf16 %v4398_v23 }
 0x2fc   :  { %v1449_v15 = vpop.xlane.xlu1 %1448 }
 0x2fd   :  { %2899 = vrcp.f32 %v1449_v15 }
 0x2fe   :  { %2901 = vrcp.f32 %v1447_v49  ;;  %v1443_v31 = vpop.xlane.xlu0 %1442  ;;  %v2892_v33 = vpop.eup %2891 }
 0x2ff   :  { %2903 = vrcp.f32 %v1443_v31  ;;  %v1628_v15 = vmul.f32 %v2892_v33, %v3554_v22  ;;  %v4399_v31 = vld [vmem:[#allocation8_spill] sm:$0xff] }
 0x300   :  { %v1445_v0 = vpop.xlane.xlu1 %1444  ;;  %v1690_v12 = vunpack.c.l.bf16 %v4399_v31 }
 0x301   :  { %2905 = vrcp.f32 %v1445_v0  ;;  %v1691_v0 = vunpack.c.h.bf16 %v4399_v31 }
 0x302   :  { %v2894_v10 = vpop.eup %2893  ;;  %v1455_v41 = vpop.xlane.xlu0 %1454 }
 0x303   :  { %v2896_v60 = vpop.eup %2895  ;;  %v1626_v11 = vmul.f32 %v2894_v10, %v3561_v59 }
 0x304   :  { %v1629_v13 = vmul.f32 %v2896_v60, %v3564_v4  ;;  %v1457_v46 = vpop.xlane.xlu1 %1456  ;;  %v1692_v4 = vunpack.c.l.bf16 %v4398_v23  ;;  %v4400_v23 = vld [vmem:[#allocation11_spill] sm:$0xff] }
 0x305   :  { %2907 = vrcp.f32 %v1457_v46  ;;  %v1754_v59 = vmul.f32 %v1690_v12, %v1626_v11 }
 0x306   :  { %v2898_v17 = vpop.eup %2897  ;;  %2909 = vrcp.f32 %v1455_v41  ;;  %v1451_v49 = vpop.xlane.xlu0 %1450  ;;  %v1757_v46 = vmul.f32 %v1693_v32, %v1629_v13  ;;  %v1756_v19 = vmul.f32 %v1692_v4, %v1628_v15  ;;  %v1697_v32 = vunpack.c.h.bf16 %v4400_v23  ;;  %v4401_v13 = vld [vmem:[#allocation10_spill] sm:$0xff] }
 0x307   :  { %2911 = vrcp.f32 %v1451_v49  ;;  %v1627_v24 = vmul.f32 %v2898_v17, %v3570_v18  ;;  %v1694_v11 = vunpack.c.l.bf16 %v4401_v13  ;;  %v1695_v15 = vunpack.c.h.bf16 %v4401_v13 }
 0x308   :  { %v1453_v60 = vpop.xlane.xlu1 %1452  ;;  %v1819_v40 = vpack.c.bf16 %v1757_v46, %v1756_v19 }
 0x309   :  { %2913 = vrcp.f32 %v1453_v60  ;;  %v1755_v10 = vmul.f32 %v1691_v0, %v1627_v24 }
 0x30a   :  { %v2900_v29 = vpop.eup %2899  ;;  %v1463_v36 = vpop.xlane.xlu0 %1462 }
 0x30b   :  { %v2902_v22 = vpop.eup %2901  ;;  %v1818_v41 = vpack.c.bf16 %v1755_v10, %v1754_v59  ;;  %v1633_v31 = vmul.f32 %v2900_v29, %v3581_v38  ;;  %v1696_v38 = vunpack.c.l.bf16 %v4400_v23  ;;  %v4403_v23 = vld [vmem:[#allocation12_spill] sm:$0xff] }
 0x30c   :  { %v2904_v33 = vpop.eup %2903  ;;  %v1465_v51 = vpop.xlane.xlu1 %1464  ;;  %v1632_v24 = vmul.f32 %v2902_v22, %v3574_v14 }
 0x30d   :  { %2915 = vrcp.f32 %v1465_v51  ;;  %2627 = vmatprep.mubr.bf16.mxu0 %v1818_v41  ;;  %v1630_v18 = vmul.f32 %v2904_v33, %v3585_v7  ;;  %v1761_v29 = vmul.f32 %v1697_v32, %v1633_v31  ;;  %v1698_v32 = vunpack.c.l.bf16 %v4403_v23 }
 0x30e   :  { %v2906_v17 = vpop.eup %2905  ;;  %2917 = vrcp.f32 %v1463_v36  ;;  %v1459_v12 = vpop.xlane.xlu0 %1458  ;;  %2628 = vmatmul.mubr.bf16.vlgmr.msra.gmra.mxu0 %v1819_v40  ;;  %v1760_v4 = vmul.f32 %v1696_v38, %v1632_v24  ;;  %v1699_v24 = vunpack.c.h.bf16 %v4403_v23 }
 0x30f   :  { %2919 = vrcp.f32 %v1459_v12  ;;  %v1631_v19 = vmul.f32 %v2906_v17, %v3592_v54  ;;  %v1758_v7 = vmul.f32 %v1694_v11, %v1630_v18  ;;  %v4402_v18 = vld [vmem:[#allocation13_spill] sm:$0xff] }
 0x310   :  { %v1461_v51 = vpop.xlane.xlu1 %1460  ;;  %v1821_v10 = vpack.c.bf16 %v1761_v29, %v1760_v4  ;;  %v1701_v17 = vunpack.c.h.bf16 %v4402_v18 }
 0x311   :  { %2921 = vrcp.f32 %v1461_v51  ;;  %v1759_v49 = vmul.f32 %v1695_v15, %v1631_v19 }
 0x312   :  { %v2908_v0 = vpop.eup %2907  ;;  %v1239_v36 = vpop.xlane.xlu0 %1238 }
 0x313   :  { %v2910_v40 = vpop.eup %2909  ;;  %v1304_v14 = vsub.f32 %v3535_v21, %v1239_v36  ;;  %v1820_v60 = vpack.c.bf16 %v1759_v49, %v1758_v7  ;;  %v1637_v22 = vmul.f32 %v2908_v0, %v3601_v1 }
 0x314   :  { %v2912_v46 = vpop.eup %2911  ;;  %v1241_v59 = vpop.xlane.xlu1 %1240  ;;  %v1636_v21 = vmul.f32 %v2910_v40, %v3595_v55 }
 0x315   :  { %v1430_v54 = vmul.f32 1.442695, %v1304_v14  ;;  %v1305_v41 = vsub.f32 %v3541_v5, %v1241_v59  ;;  %2631 = vmatprep.mubr.bf16.mxu0 %v1820_v60  ;;  %v1634_v33 = vmul.f32 %v2912_v46, %v3606_v57  ;;  %v1700_v5 = vunpack.c.l.bf16 %v4402_v18  ;;  %v4404_v14 = vld [vmem:[#allocation15_spill] sm:$0xff] }
 0x316   :  { %v2914_v31 = vpop.eup %2913  ;;  %v1467_v12 = vpop.xlane.xlu0 %1466  ;;  %2632 = vmatmul.mubr.bf16.gmra.mxu0 %v1821_v10  ;;  %v1765_v57 = vmul.f32 %v1701_v17, %v1637_v22  ;;  %v1705_v60 = vunpack.c.h.bf16 %v4404_v14  ;;  %v4405_v10 = vld [vmem:[#allocation14_spill] sm:$0xff] }
 0x317   :  { %2923 = vpow2.f32 %v1430_v54  ;;  %v1432_v13 = vmul.f32 1.442695, %v1305_v41  ;;  %v1635_v1 = vmul.f32 %v2914_v31, %v3614_v3  ;;  %v1762_v15 = vmul.f32 %v1698_v32, %v1634_v33 }
 0x318   :  { %2925 = vrcp.f32 %v1467_v12  ;;  %v1469_v11 = vpop.xlane.xlu1 %1468  ;;  %v1764_v29 = vmul.f32 %v1700_v5, %v1636_v21  ;;  %v1702_v22 = vunpack.c.l.bf16 %v4405_v10  ;;  %v1703_v54 = vunpack.c.h.bf16 %v4405_v10  ;;  %v4408_v10 = vld [vmem:[#allocation19_spill] sm:$0xff] }
 0x319   :  { %2927 = vpow2.f32 %v1432_v13  ;;  %v1763_v19 = vmul.f32 %v1699_v24, %v1635_v1 }
 0x31a   :  { %v2916_v38 = vpop.eup %2915  ;;  %2929 = vrcp.f32 %v1469_v11  ;;  %v1471_v51 = vpop.xlane.xlu0 %1470  ;;  %v1823_v36 = vpack.c.bf16 %v1765_v57, %v1764_v29  ;;  %v4406_v57 = vld [vmem:[#allocation17_spill] sm:$0xff] }
 0x31b   :  { %v2918_v7 = vpop.eup %2917  ;;  %2931 = vrcp.f32 %v1471_v51  ;;  %v1822_v55 = vpack.c.bf16 %v1763_v19, %v1762_v15  ;;  %v1641_v3 = vmul.f32 %v2916_v38, %v3623_v8  ;;  %v1704_v8 = vunpack.c.l.bf16 %v4404_v14 }
 0x31c   :  { %v2920_v49 = vpop.eup %2919  ;;  %v1473_v0 = vpop.xlane.xlu1 %1472  ;;  %v1640_v59 = vmul.f32 %v2918_v7, %v3617_v6  ;;  %v1706_v15 = vunpack.c.l.bf16 %v4406_v57  ;;  %v1707_v19 = vunpack.c.h.bf16 %v4406_v57 }
 0x31d   :  { %2933 = vrcp.f32 %v1473_v0  ;;  %2635 = vmatprep.mubr.bf16.mxu0 %v1822_v55  ;;  %v1638_v4 = vmul.f32 %v2920_v49, %v3628_v16  ;;  %v1769_v31 = vmul.f32 %v1705_v60, %v1641_v3 }
 0x31e   :  { %v2922_v40 = vpop.eup %2921  ;;  %v1475_v46 = vpop.xlane.xlu0 %1474  ;;  %2636 = vmatmul.mubr.bf16.gmra.mxu0 %v1823_v36  ;;  %v1768_v23 = vmul.f32 %v1704_v8, %v1640_v59 }
 0x31f   :  { %2935 = vrcp.f32 %v1475_v46  ;;  %v1639_v41 = vmul.f32 %v2922_v40, %v3636_v61  ;;  %v1766_v16 = vmul.f32 %v1702_v22, %v1638_v4  ;;  %v1710_v22 = vunpack.c.l.bf16 %v4408_v10 }
 0x320   :  { %v1477_v33 = vpop.xlane.xlu1 %1476  ;;  %v1825_v21 = vpack.c.bf16 %v1769_v31, %v1768_v23  ;;  %v4409_v23 = vld [vmem:[#allocation18_spill] sm:$0xff] }
 0x321   :  { %2937 = vrcp.f32 %v1477_v33  ;;  %v1767_v18 = vmul.f32 %v1703_v54, %v1639_v41  ;;  %v1711_v41 = vunpack.c.h.bf16 %v4408_v10 }
 0x322   :  { %v1479_v17 = vpop.xlane.xlu0 %1478 }
 0x323   :  { %2939 = vrcp.f32 %v1479_v17  ;;  %v1824_v32 = vpack.c.bf16 %v1767_v18, %v1766_v16 }
 0x324   :  { %v3854_v12 = vpop.eup %2923  ;;  %v1481_v6 = vpop.xlane.xlu1 %1480 }
 0x325   :  { %v2926_v24 = vpop.eup %2925  ;;  %2941 = vrcp.f32 %v1481_v6  ;;  %1558 = vadd.xlane.f32.xlu0 %v3854_v12  ;;  %2639 = vmatprep.mubr.bf16.mxu0 %v1824_v32  ;;  %v1712_v32 = vunpack.c.l.bf16 %v4409_v23 }
 0x326   :  { %v3857_v61 = vpop.eup %2927  ;;  %v1483_v13 = vpop.xlane.xlu0 %1482  ;;  %2640 = vmatmul.mubr.bf16.gmra.mxu0 %v1825_v21  ;;  %v1642_v1 = vmul.f32 %v2926_v24, %v3646_v62  ;;  %v4407_v62 = vld [vmem:[#allocation16_spill] sm:$0xff]  ;;  %v1713_v21 = vunpack.c.h.bf16 %v4409_v23 }
 0x327   :  { %v2930_v5 = vpop.eup %2929  ;;  %2943 = vrcp.f32 %v1483_v13  ;;  %1560 = vadd.xlane.f32.xlu1 %v3857_v61  ;;  %v1708_v36 = vunpack.c.l.bf16 %v4407_v62  ;;  %v1709_v3 = vunpack.c.h.bf16 %v4407_v62 }
 0x328   :  { %v2932_v11 = vpop.eup %2931  ;;  %v1485_v38 = vpop.xlane.xlu1 %1484  ;;  %v1643_v51 = vmul.f32 %v2930_v5, %v3651_v34  ;;  %v1770_v49 = vmul.f32 %v1706_v15, %v1642_v1 }
 0x329   :  { %2945 = vrcp.f32 %v1485_v38  ;;  %v1644_v29 = vmul.f32 %v2932_v11, %v3654_v9 }
 0x32a   :  { %v2934_v7 = vpop.eup %2933  ;;  %v1487_v55 = vpop.xlane.xlu0 %1486  ;;  %v1771_v0 = vmul.f32 %v1707_v19, %v1643_v51 }
 0x32b   :  { %2947 = vrcp.f32 %v1487_v55  ;;  %v1645_v4 = vmul.f32 %v2934_v7, %v3657_v28  ;;  %v1772_v46 = vmul.f32 %v1708_v36, %v1644_v29 }
 0x32c   :  { %v2936_v40 = vpop.eup %2935  ;;  %v1489_v14 = vpop.xlane.xlu1 %1488  ;;  %v1826_v60 = vpack.c.bf16 %v1771_v0, %v1770_v49 }
 0x32d   :  { %2949 = vrcp.f32 %v1489_v14  ;;  %v1773_v34 = vmul.f32 %v1709_v3, %v1645_v4  ;;  %v1646_v59 = vmul.f32 %v2936_v40, %v3662_v43 }
 0x32e   :  { %v2938_v9 = vpop.eup %2937  ;;  %2643 = vmatprep.mubr.bf16.mxu0 %v1826_v60  ;;  %v1491_v54 = vpop.xlane.xlu0 %1490 }
 0x32f   :  { %2951 = vrcp.f32 %v1491_v54  ;;  %v1827_v8 = vpack.c.bf16 %v1773_v34, %v1772_v46  ;;  %v1647_v33 = vmul.f32 %v2938_v9, %v3667_v25  ;;  %v1774_v16 = vmul.f32 %v1710_v22, %v1646_v59 }
 0x330   :  { %v2940_v28 = vpop.eup %2939  ;;  %v1493_v31 = vpop.xlane.xlu1 %1492 }
 0x331   :  { %2953 = vrcp.f32 %v1493_v31  ;;  %2644 = vmatmul.mubr.bf16.gmra.mxu0 %v1827_v8  ;;  %v1775_v18 = vmul.f32 %v1711_v41, %v1647_v33  ;;  %v1648_v17 = vmul.f32 %v2940_v28, %v3670_v30  ;;  %v4410_v30 = vld [vmem:[#allocation21_spill] sm:$0xff] }
 0x332   :  { %v2942_v43 = vpop.eup %2941  ;;  %v1495_v6 = vpop.xlane.xlu0 %1494  ;;  %v1714_v19 = vunpack.c.l.bf16 %v4410_v30  ;;  %v1715_v51 = vunpack.c.h.bf16 %v4410_v30 }
 0x333   :  { %2955 = vrcp.f32 %v1495_v6  ;;  %v1828_v24 = vpack.c.bf16 %v1775_v18, %v1774_v16  ;;  %v1649_v13 = vmul.f32 %v2942_v43, %v3673_v45  ;;  %v1776_v5 = vmul.f32 %v1712_v32, %v1648_v17 }
 0x334   :  { %v2944_v1 = vpop.eup %2943  ;;  %v1497_v25 = vpop.xlane.xlu1 %1496 }
 0x335   :  { %2957 = vrcp.f32 %v1497_v25  ;;  %2647 = vmatprep.mubr.bf16.mxu0 %v1828_v24  ;;  %v1777_v11 = vmul.f32 %v1713_v21, %v1649_v13  ;;  %v1650_v57 = vmul.f32 %v2944_v1, %v3678_v20  ;;  %v4411_v20 = vld [vmem:[#allocation20_spill] sm:$0xff] }
 0x336   :  { %v2946_v15 = vpop.eup %2945  ;;  %v1499_v38 = vpop.xlane.xlu0 %1498  ;;  %v1716_v3 = vunpack.c.l.bf16 %v4411_v20  ;;  %v1717_v40 = vunpack.c.h.bf16 %v4411_v20 }
 0x337   :  { %2959 = vrcp.f32 %v1499_v38  ;;  %v1829_v29 = vpack.c.bf16 %v1777_v11, %v1776_v5  ;;  %v1651_v7 = vmul.f32 %v2946_v15, %v3683_v56  ;;  %v1778_v49 = vmul.f32 %v1714_v19, %v1650_v57 }
 0x338   :  { %v2948_v55 = vpop.eup %2947  ;;  %v1501_v45 = vpop.xlane.xlu1 %1500 }
 0x339   :  { %2961 = vrcp.f32 %v1501_v45  ;;  %2648 = vmatmul.mubr.bf16.gmra.mxu0 %v1829_v29  ;;  %v1779_v0 = vmul.f32 %v1715_v51, %v1651_v7  ;;  %v1652_v62 = vmul.f32 %v2948_v55, %v3686_v42  ;;  %v4412_v42 = vld [vmem:[#allocation23_spill] sm:$0xff] }
 0x33a   :  { %v2950_v36 = vpop.eup %2949  ;;  %v1503_v4 = vpop.xlane.xlu0 %1502  ;;  %v1718_v22 = vunpack.c.l.bf16 %v4412_v42  ;;  %v1719_v41 = vunpack.c.h.bf16 %v4412_v42 }
 0x33b   :  { %2963 = vrcp.f32 %v1503_v4  ;;  %v1830_v14 = vpack.c.bf16 %v1779_v0, %v1778_v49  ;;  %v1653_v60 = vmul.f32 %v2950_v36, %v3689_v39  ;;  %v1780_v34 = vmul.f32 %v1716_v3, %v1652_v62 }
 0x33c   :  { %v2952_v46 = vpop.eup %2951  ;;  %v1505_v56 = vpop.xlane.xlu1 %1504 }
 0x33d   :  { %2965 = vrcp.f32 %v1505_v56  ;;  %2651 = vmatprep.mubr.bf16.mxu0 %v1830_v14  ;;  %v1781_v59 = vmul.f32 %v1717_v40, %v1653_v60  ;;  %v1654_v9 = vmul.f32 %v2952_v46, %v3694_v2  ;;  %v4413_v2 = vld [vmem:[#allocation22_spill] sm:$0xff] }
 0x33e   :  { %v2954_v10 = vpop.eup %2953  ;;  %v1507_v54 = vpop.xlane.xlu0 %1506  ;;  %v1720_v43 = vunpack.c.l.bf16 %v4413_v2  ;;  %v1721_v32 = vunpack.c.h.bf16 %v4413_v2 }
 0x33f   :  { %2967 = vrcp.f32 %v1507_v54  ;;  %v1831_v8 = vpack.c.bf16 %v1781_v59, %v1780_v34  ;;  %v1655_v33 = vmul.f32 %v2954_v10, %v3699_v48  ;;  %v1782_v31 = vmul.f32 %v1718_v22, %v1654_v9 }
 0x340   :  { %v2956_v28 = vpop.eup %2955  ;;  %v1509_v39 = vpop.xlane.xlu1 %1508 }
 0x341   :  { %2969 = vrcp.f32 %v1509_v39  ;;  %2652 = vmatmul.mubr.bf16.gmra.mxu0 %v1831_v8  ;;  %v1783_v16 = vmul.f32 %v1719_v41, %v1655_v33  ;;  %v1656_v18 = vmul.f32 %v2956_v28, %v3702_v47  ;;  %v4414_v47 = vld [vmem:[#allocation24_spill] sm:$0xff] }
 0x342   :  { %v2958_v17 = vpop.eup %2957  ;;  %v1511_v23 = vpop.xlane.xlu0 %1510  ;;  %v1722_v11 = vunpack.c.l.bf16 %v4414_v47  ;;  %v1723_v15 = vunpack.c.h.bf16 %v4414_v47 }
 0x343   :  { %2971 = vrcp.f32 %v1511_v23  ;;  %v1832_v6 = vpack.c.bf16 %v1783_v16, %v1782_v31  ;;  %v1657_v21 = vmul.f32 %v2958_v17, %v3705_v44  ;;  %v1784_v13 = vmul.f32 %v1720_v43, %v1656_v18 }
 0x344   :  { %v2960_v24 = vpop.eup %2959  ;;  %v1513_v48 = vpop.xlane.xlu1 %1512 }
 0x345   :  { %2973 = vrcp.f32 %v1513_v48  ;;  %2655 = vmatprep.mubr.bf16.mxu0 %v1832_v6  ;;  %v1785_v1 = vmul.f32 %v1721_v32, %v1657_v21  ;;  %v1658_v25 = vmul.f32 %v2960_v24, %v3710_v52  ;;  %v4415_v52 = vld [vmem:[#allocation25_spill] sm:$0xff]  ;;  %v4419_v21 = vld [vmem:[#allocation40_spill] sm:$0xff] }
 0x346   :  { %v2962_v5 = vpop.eup %2961  ;;  %v1515_v57 = vpop.xlane.xlu0 %1514  ;;  %v1724_v45 = vunpack.c.l.bf16 %v4415_v52  ;;  %v1725_v0 = vunpack.c.h.bf16 %v4415_v52 }
 0x347   :  { %2975 = vrcp.f32 %v1515_v57  ;;  %v1833_v30 = vpack.c.bf16 %v1785_v1, %v1784_v13  ;;  %v1659_v19 = vmul.f32 %v2962_v5, %v3715_v58  ;;  %v1786_v51 = vmul.f32 %v1722_v11, %v1658_v25  ;;  %v4420_v25 = vld [vmem:[#allocation41_spill] sm:$0xff] }
 0x348   :  { %v2964_v38 = vpop.eup %2963  ;;  %v1517_v44 = vpop.xlane.xlu1 %1516 }
 0x349   :  { %2977 = vrcp.f32 %v1517_v44  ;;  %2656 = vmatmul.mubr.bf16.gmra.mxu0 %v1833_v30  ;;  %v1787_v29 = vmul.f32 %v1723_v15, %v1659_v19  ;;  %v1660_v7 = vmul.f32 %v2964_v38, %v3718_v27  ;;  %v4416_v27 = vld [vmem:[#allocation26_spill] sm:$0xff] }
 0x34a   :  { %v2966_v55 = vpop.eup %2965  ;;  %v1519_v49 = vpop.xlane.xlu0 %1518  ;;  %v1726_v60 = vunpack.c.l.bf16 %v4416_v27  ;;  %v1727_v56 = vunpack.c.h.bf16 %v4416_v27  ;;  %v4422_v19 = vld [vmem:[#allocation42_spill] sm:$0xff] }
 0x34b   :  { %2979 = vrcp.f32 %v1519_v49  ;;  %v1834_v62 = vpack.c.bf16 %v1787_v29, %v1786_v51  ;;  %v1661_v36 = vmul.f32 %v2966_v55, %v3721_v26  ;;  %v1788_v3 = vmul.f32 %v1724_v45, %v1660_v7  ;;  %v4423_v55 = vld [vmem:[#allocation43_spill] sm:$0xff]  ;;  %v4424_v49 = vld [vmem:[#allocation30_spill] sm:$0xff] }
 0x34c   :  { %v2968_v20 = vpop.eup %2967  ;;  %v1521_v58 = vpop.xlane.xlu1 %1520 }
 0x34d   :  { %2981 = vrcp.f32 %v1521_v58  ;;  %2659 = vmatprep.mubr.bf16.mxu0 %v1834_v62  ;;  %v1789_v4 = vmul.f32 %v1725_v0, %v1661_v36  ;;  %v1662_v40 = vmul.f32 %v2968_v20, %v3726_v35  ;;  %v4417_v35 = vld [vmem:[#allocation27_spill] sm:$0xff]  ;;  %v1734_v0 = vunpack.c.l.bf16 %v4424_v49  ;;  %v4425_v58 = vld [vmem:[#allocation44_spill] sm:$0xff] }
 0x34e   :  { %v2970_v14 = vpop.eup %2969  ;;  %v1523_v46 = vpop.xlane.xlu0 %1522  ;;  %v1728_v41 = vunpack.c.l.bf16 %v4417_v35  ;;  %v1729_v33 = vunpack.c.h.bf16 %v4417_v35  ;;  %v1735_v36 = vunpack.c.h.bf16 %v4424_v49 }
 0x34f   :  { %2983 = vrcp.f32 %v1523_v46  ;;  %v1835_v34 = vpack.c.bf16 %v1789_v4, %v1788_v3  ;;  %v1663_v59 = vmul.f32 %v2970_v14, %v3731_v63  ;;  %v1790_v10 = vmul.f32 %v1726_v60, %v1662_v40  ;;  %v4426_v60 = vld [vmem:[#allocation45_spill] sm:$0xff] }
 0x350   :  { %v2972_v9 = vpop.eup %2971  ;;  %v1525_v26 = vpop.xlane.xlu1 %1524 }
 0x351   :  { %2985 = vrcp.f32 %v1525_v26  ;;  %2660 = vmatmul.mubr.bf16.gmra.mxu0 %v1835_v34  ;;  %v1791_v42 = vmul.f32 %v1727_v56, %v1663_v59  ;;  %v1664_v22 = vmul.f32 %v2972_v9, %v3734_v53  ;;  %v4418_v53 = vld [vmem:[#allocation28_spill] sm:$0xff]  ;;  %v4427_v34 = vld [vmem:[#allocation31_spill] sm:$0xff] }
 0x352   :  { %v2974_v54 = vpop.eup %2973  ;;  %v1527_v8 = vpop.xlane.xlu0 %1526  ;;  %v1730_v43 = vunpack.c.l.bf16 %v4418_v53  ;;  %v1731_v32 = vunpack.c.h.bf16 %v4418_v53  ;;  %v1736_v59 = vunpack.c.l.bf16 %v4427_v34  ;;  %v1737_v26 = vunpack.c.h.bf16 %v4427_v34 }
 0x353   :  { %2987 = vrcp.f32 %v1527_v8  ;;  %v1836_v28 = vpack.c.bf16 %v1791_v42, %v1790_v10  ;;  %v1665_v39 = vmul.f32 %v2974_v54, %v3737_v50  ;;  %v1792_v16 = vmul.f32 %v1728_v41, %v1664_v22  ;;  %v4428_v42 = vld [vmem:[#allocation46_spill] sm:$0xff] }
 0x354   :  { %v2976_v31 = vpop.eup %2975  ;;  %v1529_v63 = vpop.xlane.xlu1 %1528 }
 0x355   :  { %2989 = vrcp.f32 %v1529_v63  ;;  %2663 = vmatprep.mubr.bf16.mxu0 %v1836_v28  ;;  %v1793_v18 = vmul.f32 %v1729_v33, %v1665_v39  ;;  %v1666_v17 = vmul.f32 %v2976_v31, %v3742_v37  ;;  %v4421_v37 = vld [vmem:[#allocation29_spill] sm:$0xff]  ;;  %v4429_v33 = vld [vmem:[#allocation47_spill] sm:$0xff]  ;;  %v4430_v31 = vld [vmem:[#allocation32_spill] sm:$0xff] }
 0x356   :  { %v2978_v2 = vpop.eup %2977  ;;  %v1531_v23 = vpop.xlane.xlu0 %1530  ;;  %v1732_v11 = vunpack.c.l.bf16 %v4421_v37  ;;  %v1733_v15 = vunpack.c.h.bf16 %v4421_v37  ;;  %v1738_v63 = vunpack.c.l.bf16 %v4430_v31 }
 0x357   :  { %2991 = vrcp.f32 %v1531_v23  ;;  %v1837_v6 = vpack.c.bf16 %v1793_v18, %v1792_v16  ;;  %v1667_v24 = vmul.f32 %v2978_v2, %v4419_v21  ;;  %v1794_v13 = vmul.f32 %v1730_v43, %v1666_v17  ;;  %v4431_v2 = vld [vmem:[#allocation48_spill] sm:$0xff]  ;;  %v4432_v21 = vld [vmem:[#allocation49_spill] sm:$0xff] }
 0x358   :  { %v2980_v48 = vpop.eup %2979  ;;  %v1533_v50 = vpop.xlane.xlu1 %1532  ;;  %v1739_v18 = vunpack.c.h.bf16 %v4430_v31 }
 0x359   :  { %2993 = vrcp.f32 %v1533_v50  ;;  %2664 = vmatmul.mubr.bf16.gmra.mxu0 %v1837_v6  ;;  %v1795_v1 = vmul.f32 %v1731_v32, %v1667_v24  ;;  %v1668_v5 = vmul.f32 %v2980_v48, %v4420_v25  ;;  %v4433_v50 = vld [vmem:[#allocation33_spill] sm:$0xff] }
 0x35a   :  { %v2982_v47 = vpop.eup %2981  ;;  %v1535_v57 = vpop.xlane.xlu0 %1534  ;;  %v1741_v25 = vunpack.c.h.bf16 %v4433_v50 }
 0x35b   :  { %2995 = vrcp.f32 %v1535_v57  ;;  %v1838_v30 = vpack.c.bf16 %v1795_v1, %v1794_v13  ;;  %v1669_v38 = vmul.f32 %v2982_v47, %v4422_v19  ;;  %v1796_v29 = vmul.f32 %v1732_v11, %v1668_v5  ;;  %v4434_v47 = vld [vmem:[#allocation50_spill] sm:$0xff]  ;;  %v4435_v19 = vld [vmem:[#allocation51_spill] sm:$0xff] }
 0x35c   :  { %v2984_v44 = vpop.eup %2983  ;;  %v1537_v51 = vpop.xlane.xlu1 %1536  ;;  %v1740_v13 = vunpack.c.l.bf16 %v4433_v50 }
 0x35d   :  { %2997 = vrcp.f32 %v1537_v51  ;;  %2667 = vmatprep.mubr.bf16.mxu0 %v1838_v30  ;;  %v1797_v7 = vmul.f32 %v1733_v15, %v1669_v38  ;;  %v1670_v52 = vmul.f32 %v2984_v44, %v4423_v55  ;;  %v4436_v51 = vld [vmem:[#allocation34_spill] sm:$0xff] }
 0x35e   :  { %v2986_v45 = vpop.eup %2985  ;;  %v1539_v62 = vpop.xlane.xlu0 %1538  ;;  %v1743_v55 = vunpack.c.h.bf16 %v4436_v51 }
 0x35f   :  { %2999 = vrcp.f32 %v1539_v62  ;;  %v1839_v20 = vpack.c.bf16 %v1797_v7, %v1796_v29  ;;  %v1671_v3 = vmul.f32 %v2986_v45, %v4425_v58  ;;  %v1798_v14 = vmul.f32 %v1734_v0, %v1670_v52  ;;  %v4437_v45 = vld [vmem:[#allocation52_spill] sm:$0xff]  ;;  %v4438_v58 = vld [vmem:[#allocation53_spill] sm:$0xff] }
 0x360   :  { %v2988_v4 = vpop.eup %2987  ;;  %v1541_v40 = vpop.xlane.xlu1 %1540  ;;  %v1742_v29 = vunpack.c.l.bf16 %v4436_v51 }
 0x361   :  { %3001 = vrcp.f32 %v1541_v40  ;;  %2668 = vmatmul.mubr.bf16.gmra.mxu0 %v1839_v20  ;;  %v1799_v27 = vmul.f32 %v1735_v36, %v1671_v3  ;;  %v1672_v46 = vmul.f32 %v2988_v4, %v4426_v60  ;;  %v4439_v40 = vld [vmem:[#allocation35_spill] sm:$0xff] }
 0x362   :  { %v2990_v56 = vpop.eup %2989  ;;  %v1543_v9 = vpop.xlane.xlu0 %1542 }
 0x363   :  { %3003 = vrcp.f32 %v1543_v9  ;;  %v1840_v10 = vpack.c.bf16 %v1799_v27, %v1798_v14  ;;  %v1673_v22 = vmul.f32 %v2990_v56, %v4428_v42  ;;  %v1800_v41 = vmul.f32 %v1736_v59, %v1672_v46  ;;  %v4440_v46 = vld [vmem:[#allocation54_spill] sm:$0xff] }
 0x364   :  { %v2992_v54 = vpop.eup %2991  ;;  %v1545_v35 = vpop.xlane.xlu1 %1544  ;;  %v1744_v14 = vunpack.c.l.bf16 %v4439_v40  ;;  %v1745_v27 = vunpack.c.h.bf16 %v4439_v40 }
 0x365   :  { %3005 = vrcp.f32 %v1545_v35  ;;  %2671 = vmatprep.mubr.bf16.mxu0 %v1840_v10  ;;  %v1801_v8 = vmul.f32 %v1737_v26, %v1673_v22  ;;  %v1674_v28 = vmul.f32 %v2992_v54, %v4429_v33  ;;  %v4441_v26 = vld [vmem:[#allocation55_spill] sm:$0xff]  ;;  %v4442_v22 = vld [vmem:[#allocation36_spill] sm:$0xff] }
 0x366   :  { %v2994_v39 = vpop.eup %2993  ;;  %v1547_v16 = vpop.xlane.xlu0 %1546  ;;  %v1746_v54 = vunpack.c.l.bf16 %v4442_v22  ;;  %v1747_v35 = vunpack.c.h.bf16 %v4442_v22 }
 0x367   :  { %3007 = vrcp.f32 %v1547_v16  ;;  %v1841_v17 = vpack.c.bf16 %v1801_v8, %v1800_v41  ;;  %v1675_v53 = vmul.f32 %v2994_v39, %v4431_v2  ;;  %v1802_v32 = vmul.f32 %v1738_v63, %v1674_v28  ;;  %v4443_v8 = vld [vmem:[#allocation56_spill] sm:$0xff]  ;;  %v4444_v63 = vld [vmem:[#allocation57_spill] sm:$0xff] }
 0x368   :  { %v2996_v43 = vpop.eup %2995  ;;  %v1549_v23 = vpop.xlane.xlu1 %1548 }
 0x369   :  { %3009 = vrcp.f32 %v1549_v23  ;;  %2672 = vmatmul.mubr.bf16.gmra.mxu0 %v1841_v17  ;;  %v1803_v6 = vmul.f32 %v1739_v18, %v1675_v53  ;;  %v1676_v24 = vmul.f32 %v2996_v43, %v4432_v21  ;;  %v4445_v17 = vld [vmem:[#allocation37_spill] sm:$0xff]  ;;  %v4446_v23 = vld [vmem:[#allocation58_spill] sm:$0xff] }
 0x36a   :  { %v2998_v48 = vpop.eup %2997  ;;  %v1551_v1 = vpop.xlane.xlu0 %1550  ;;  %v1748_v2 = vunpack.c.l.bf16 %v4445_v17  ;;  %v1749_v53 = vunpack.c.h.bf16 %v4445_v17 }
 0x36b   :  { %3011 = vrcp.f32 %v1551_v1  ;;  %v1842_v5 = vpack.c.bf16 %v1803_v6, %v1802_v32  ;;  %v1677_v37 = vmul.f32 %v2998_v48, %v4434_v47  ;;  %v1804_v15 = vmul.f32 %v1740_v13, %v1676_v24  ;;  %v4447_v48 = vld [vmem:[#allocation59_spill] sm:$0xff]  ;;  %v4448_v1 = vld [vmem:[#allocation38_spill] sm:$0xff] }
 0x36c   :  { %v3000_v11 = vpop.eup %2999  ;;  %v1553_v57 = vpop.xlane.xlu1 %1552 }
 0x36d   :  { %3013 = vrcp.f32 %v1553_v57  ;;  %2675 = vmatprep.mubr.bf16.mxu0 %v1842_v5  ;;  %v1805_v30 = vmul.f32 %v1741_v25, %v1677_v37  ;;  %v1678_v38 = vmul.f32 %v3000_v11, %v4435_v19  ;;  %v1750_v25 = vunpack.c.l.bf16 %v4448_v1  ;;  %v4449_v37 = vld [vmem:[#allocation60_spill] sm:$0xff] }
 0x36e   :  { %v3002_v44 = vpop.eup %3001  ;;  %v1555_v7 = vpop.xlane.xlu0 %1554  ;;  %v1751_v5 = vunpack.c.h.bf16 %v4448_v1 }
 0x36f   :  { %3015 = vrcp.f32 %v1555_v7  ;;  %v1843_v52 = vpack.c.bf16 %v1805_v30, %v1804_v15  ;;  %v1679_v49 = vmul.f32 %v3002_v44, %v4437_v45  ;;  %v1806_v36 = vmul.f32 %v1742_v29, %v1678_v38  ;;  %v4450_v7 = vld [vmem:[#allocation39_spill] sm:$0xff] }
 0x370   :  { %v3004_v0 = vpop.eup %3003  ;;  %v1557_v62 = vpop.xlane.xlu1 %1556 }
 0x371   :  { %3017 = vrcp.f32 %v1557_v62  ;;  %2676 = vmatmul.mubr.bf16.gmra.mxu0 %v1843_v52  ;;  %v1807_v20 = vmul.f32 %v1743_v55, %v1679_v49  ;;  %v1680_v3 = vmul.f32 %v3004_v0, %v4438_v58  ;;  %v1752_v55 = vunpack.c.l.bf16 %v4450_v7 }
 0x372   :  { %v3006_v4 = vpop.eup %3005  ;;  %v1753_v52 = vunpack.c.h.bf16 %v4450_v7 }
 0x373   :  { %v1844_v60 = vpack.c.bf16 %v1807_v20, %v1806_v36  ;;  %v1681_v56 = vmul.f32 %v3006_v4, %v4440_v46  ;;  %v1808_v59 = vmul.f32 %v1744_v14, %v1680_v3 }
 0x374   :  { %v3008_v34 = vpop.eup %3007 }
 0x375   :  { %2679 = vmatprep.mubr.bf16.mxu0 %v1844_v60  ;;  %v1809_v9 = vmul.f32 %v1745_v27, %v1681_v56  ;;  %v1682_v10 = vmul.f32 %v3008_v34, %v4441_v26 }
 0x376   :  { %v3010_v42 = vpop.eup %3009 }
 0x377   :  { %v1845_v41 = vpack.c.bf16 %v1809_v9, %v1808_v59  ;;  %v1683_v33 = vmul.f32 %v3010_v42, %v4443_v8  ;;  %v1810_v39 = vmul.f32 %v1746_v54, %v1682_v10 }
 0x378   :  { %v3012_v28 = vpop.eup %3011 }
 0x379   :  { %2680 = vmatmul.mubr.bf16.gmra.mxu0 %v1845_v41  ;;  %v1811_v31 = vmul.f32 %v1747_v35, %v1683_v33  ;;  %v1684_v16 = vmul.f32 %v3012_v28, %v4444_v63 }
 0x37a   :  { %v3014_v18 = vpop.eup %3013 }
 0x37b   :  { %v1846_v43 = vpack.c.bf16 %v1811_v31, %v1810_v39  ;;  %v1685_v32 = vmul.f32 %v3014_v18, %v4446_v23  ;;  %v1812_v21 = vmul.f32 %v1748_v2, %v1684_v16 }
 0x37c   :  { %v3016_v6 = vpop.eup %3015 }
 0x37d   :  { %2683 = vmatprep.mubr.bf16.mxu0 %v1846_v43  ;;  %v1813_v24 = vmul.f32 %v1749_v53, %v1685_v32  ;;  %v1686_v50 = vmul.f32 %v3016_v6, %v4447_v48 }
 0x37e   :  { %v3018_v13 = vpop.eup %3017 }
 0x37f   :  { %v1847_v47 = vpack.c.bf16 %v1813_v24, %v1812_v21  ;;  %v1687_v11 = vmul.f32 %v3018_v13, %v4449_v37  ;;  %v1814_v57 = vmul.f32 %v1750_v25, %v1686_v50 }
 0x381   :  { %2684 = vmatmul.mubr.bf16.gmra.mxu0 %v1847_v47  ;;  %v1815_v15 = vmul.f32 %v1751_v5, %v1687_v11 }
 0x383   :  { %v1848_v30 = vpack.c.bf16 %v1815_v15, %v1814_v57 }
 0x385   :  { %2687 = vmatprep.mubr.bf16.mxu0 %v1848_v30 }
 0x3ae   :  { %v1559_v19 = vpop.xlane.xlu0 %1558 }
 0x3af   :  { %3019 = vrcp.f32 %v1559_v19 }
 0x3b0   :  { %v1561_v38 = vpop.xlane.xlu1 %1560 }
 0x3b1   :  { %3021 = vrcp.f32 %v1561_v38 }
 0x3bc   :  { %v3020_v44 = vpop.eup %3019 }
 0x3bd   :  { %v1688_v51 = vmul.f32 %v3020_v44, %v3854_v12 }
 0x3be   :  { %v3022_v29 = vpop.eup %3021 }
 0x3bf   :  { %v1689_v45 = vmul.f32 %v3022_v29, %v3857_v61  ;;  %v1816_v49 = vmul.f32 %v1752_v55, %v1688_v51 }
 0x3c1   :  { %v1817_v0 = vmul.f32 %v1753_v52, %v1689_v45 }
 0x3c3   :  { %v1849_v62 = vpack.c.bf16 %v1817_v0, %v1816_v49 }
 0x3c5   :  { %2688 = vmatmul.mubr.bf16.gmra.mxu0 %v1849_v62 }
 0x3ce   :  { %v2629_v36 = vpop.f32.mrf.mxu0 }
 0x3cf   :  { %2206 = vst.msk [vmem:[%s4217_s5 + $0x10] sm:$0xff] %vm2203_vm0, %v2629_v36 }
 0x3d0   :  { %v1948_v20 = vpop.f32.mrf.mxu0 }
 0x3d1   :  { %2204 = vst.msk [vmem:[%s4217_s5] sm:$0xff] %vm2203_vm0, %v1948_v20 }
 0x3d2   :  { %v2630_v12 = vpop.f32.mrf.mxu0 }
 0x3d3   :  { %2207 = vst.msk [vmem:[%s4217_s5 + $0x18] sm:$0xff] %vm2203_vm0, %v2630_v12 }
 0x3d4   :  { %v1951_v61 = vpop.f32.mrf.mxu0 }
 0x3d5   :  { %2205 = vst.msk [vmem:[%s4217_s5 + $0x8] sm:$0xff] %vm2203_vm0, %v1951_v61 }
 0x3d6   :  { %v2633_v58 = vpop.f32.mrf.mxu0 }
 0x3d7   :  { %2210 = vst.msk [vmem:[%s4217_s5 + $0x30] sm:$0xff] %vm2203_vm0, %v2633_v58 }
 0x3d8   :  { %v1964_v3 = vpop.f32.mrf.mxu0 }
 0x3d9   :  { %2208 = vst.msk [vmem:[%s4217_s5 + $0x20] sm:$0xff] %vm2203_vm0, %v1964_v3 }
 0x3da   :  { %v2634_v4 = vpop.f32.mrf.mxu0 }
 0x3db   :  { %2211 = vst.msk [vmem:[%s4217_s5 + $0x38] sm:$0xff] %vm2203_vm0, %v2634_v4 }
 0x3dc   :  { %v1967_v40 = vpop.f32.mrf.mxu0 }
 0x3dd   :  { %2209 = vst.msk [vmem:[%s4217_s5 + $0x28] sm:$0xff] %vm2203_vm0, %v1967_v40 }
 0x3de   :  { %v2637_v14 = vpop.f32.mrf.mxu0 }
 0x3df   :  { %2214 = vst.msk [vmem:[%s4217_s5 + $0x50] sm:$0xff] %vm2203_vm0, %v2637_v14 }
 0x3e0   :  { %v1980_v27 = vpop.f32.mrf.mxu0 }
 0x3e1   :  { %2212 = vst.msk [vmem:[%s4217_s5 + $0x40] sm:$0xff] %vm2203_vm0, %v1980_v27 }
 0x3e2   :  { %v2638_v60 = vpop.f32.mrf.mxu0 }
 0x3e3   :  { %2215 = vst.msk [vmem:[%s4217_s5 + $0x58] sm:$0xff] %vm2203_vm0, %v2638_v60 }
 0x3e4   :  { %v1983_v46 = vpop.f32.mrf.mxu0 }
 0x3e5   :  { %2213 = vst.msk [vmem:[%s4217_s5 + $0x48] sm:$0xff] %vm2203_vm0, %v1983_v46 }
 0x3e6   :  { %v2641_v56 = vpop.f32.mrf.mxu0 }
 0x3e7   :  { %2218 = vst.msk [vmem:[%s4217_s5 + $0x70] sm:$0xff] %vm2203_vm0, %v2641_v56 }
 0x3e8   :  { %v1996_v34 = vpop.f32.mrf.mxu0 }
 0x3e9   :  { %2216 = vst.msk [vmem:[%s4217_s5 + $0x60] sm:$0xff] %vm2203_vm0, %v1996_v34 }
 0x3ea   :  { %v2642_v59 = vpop.f32.mrf.mxu0 }
 0x3eb   :  { %2219 = vst.msk [vmem:[%s4217_s5 + $0x78] sm:$0xff] %vm2203_vm0, %v2642_v59 }
 0x3ec   :  { %v1999_v9 = vpop.f32.mrf.mxu0 }
 0x3ed   :  { %2217 = vst.msk [vmem:[%s4217_s5 + $0x68] sm:$0xff] %vm2203_vm0, %v1999_v9 }
 0x3f1   :  { %v2645_v26 = vpop.f32.mrf.mxu0 }
 0x3f2   :  { %2222 = vst.msk [vmem:[%s4217_s5 + $0x90] sm:$0xff] %vm2203_vm0, %v2645_v26 }
 0x3f3   :  { %v2012_v10 = vpop.f32.mrf.mxu0 }
 0x3f4   :  { %2220 = vst.msk [vmem:[%s4217_s5 + $0x80] sm:$0xff] %vm2203_vm0, %v2012_v10 }
 0x3f5   :  { %v2646_v42 = vpop.f32.mrf.mxu0 }
 0x3f6   :  { %2223 = vst.msk [vmem:[%s4217_s5 + $0x98] sm:$0xff] %vm2203_vm0, %v2646_v42 }
 0x3f7   :  { %v2015_v22 = vpop.f32.mrf.mxu0 }
 0x3f8   :  { %2221 = vst.msk [vmem:[%s4217_s5 + $0x88] sm:$0xff] %vm2203_vm0, %v2015_v22 }
 0x3f9   :  { %v2649_v54 = vpop.f32.mrf.mxu0 }
 0x3fa   :  { %2226 = vst.msk [vmem:[%s4217_s5 + $0xb0] sm:$0xff] %vm2203_vm0, %v2649_v54 }
 0x3fb   :  { %v2028_v35 = vpop.f32.mrf.mxu0 }
 0x3fc   :  { %2224 = vst.msk [vmem:[%s4217_s5 + $0xa0] sm:$0xff] %vm2203_vm0, %v2028_v35 }
 0x3fd   :  { %v2650_v41 = vpop.f32.mrf.mxu0 }
 0x3fe   :  { %2227 = vst.msk [vmem:[%s4217_s5 + $0xb8] sm:$0xff] %vm2203_vm0, %v2650_v41 }
 0x3ff   :  { %v2031_v8 = vpop.f32.mrf.mxu0 }
 0x400   :  { %2225 = vst.msk [vmem:[%s4217_s5 + $0xa8] sm:$0xff] %vm2203_vm0, %v2031_v8 }
 0x401   :  { %v2653_v33 = vpop.f32.mrf.mxu0 }
 0x402   :  { %2230 = vst.msk [vmem:[%s4217_s5 + $0xd0] sm:$0xff] %vm2203_vm0, %v2653_v33 }
 0x403   :  { %v2044_v28 = vpop.f32.mrf.mxu0 }
 0x404   :  { %2228 = vst.msk [vmem:[%s4217_s5 + $0xc0] sm:$0xff] %vm2203_vm0, %v2044_v28 }
 0x405   :  { %v2654_v39 = vpop.f32.mrf.mxu0 }
 0x406   :  { %2231 = vst.msk [vmem:[%s4217_s5 + $0xd8] sm:$0xff] %vm2203_vm0, %v2654_v39 }
 0x407   :  { %v2047_v31 = vpop.f32.mrf.mxu0 }
 0x408   :  { %2229 = vst.msk [vmem:[%s4217_s5 + $0xc8] sm:$0xff] %vm2203_vm0, %v2047_v31 }
 0x409   :  { %v2657_v63 = vpop.f32.mrf.mxu0 }
 0x40a   :  { %2234 = vst.msk [vmem:[%s4217_s5 + $0xf0] sm:$0xff] %vm2203_vm0, %v2657_v63 }
 0x40b   :  { %v2060_v16 = vpop.f32.mrf.mxu0 }
 0x40c   :  { %2232 = vst.msk [vmem:[%s4217_s5 + $0xe0] sm:$0xff] %vm2203_vm0, %v2060_v16 }
 0x40d   :  { %v2658_v18 = vpop.f32.mrf.mxu0 }
 0x40e   :  { %2235 = vst.msk [vmem:[%s4217_s5 + $0xf8] sm:$0xff] %vm2203_vm0, %v2658_v18 }
 0x40f   :  { %v2063_v17 = vpop.f32.mrf.mxu0 }
 0x410   :  { %2233 = vst.msk [vmem:[%s4217_s5 + $0xe8] sm:$0xff] %vm2203_vm0, %v2063_v17 }
 0x411   :  { %v2661_v2 = vpop.f32.mrf.mxu0 }
 0x412   :  { %2238 = vst.msk [vmem:[%s4217_s5 + $0x110] sm:$0xff] %vm2203_vm0, %v2661_v2 }
 0x413   :  { %v2076_v53 = vpop.f32.mrf.mxu0 }
 0x414   :  { %2236 = vst.msk [vmem:[%s4217_s5 + $0x100] sm:$0xff] %vm2203_vm0, %v2076_v53 }
 0x415   :  { %v2662_v43 = vpop.f32.mrf.mxu0 }
 0x416   :  { %2239 = vst.msk [vmem:[%s4217_s5 + $0x118] sm:$0xff] %vm2203_vm0, %v2662_v43 }
 0x417   :  { %v2079_v23 = vpop.f32.mrf.mxu0 }
 0x418   :  { %2237 = vst.msk [vmem:[%s4217_s5 + $0x108] sm:$0xff] %vm2203_vm0, %v2079_v23 }
 0x419   :  { %v2665_v32 = vpop.f32.mrf.mxu0 }
 0x41a   :  { %2242 = vst.msk [vmem:[%s4217_s5 + $0x130] sm:$0xff] %vm2203_vm0, %v2665_v32 }
 0x41b   :  { %v2092_v6 = vpop.f32.mrf.mxu0 }
 0x41c   :  { %2240 = vst.msk [vmem:[%s4217_s5 + $0x120] sm:$0xff] %vm2203_vm0, %v2092_v6 }
 0x41d   :  { %v2666_v21 = vpop.f32.mrf.mxu0 }
 0x41e   :  { %2243 = vst.msk [vmem:[%s4217_s5 + $0x138] sm:$0xff] %vm2203_vm0, %v2666_v21 }
 0x41f   :  { %v2095_v24 = vpop.f32.mrf.mxu0 }
 0x420   :  { %2241 = vst.msk [vmem:[%s4217_s5 + $0x128] sm:$0xff] %vm2203_vm0, %v2095_v24 }
 0x421   :  { %v2669_v48 = vpop.f32.mrf.mxu0 }
 0x422   :  { %2246 = vst.msk [vmem:[%s4217_s5 + $0x150] sm:$0xff] %vm2203_vm0, %v2669_v48 }
 0x423   :  { %v2108_v50 = vpop.f32.mrf.mxu0 }
 0x424   :  { %2244 = vst.msk [vmem:[%s4217_s5 + $0x140] sm:$0xff] %vm2203_vm0, %v2108_v50 }
 0x425   :  { %v2670_v13 = vpop.f32.mrf.mxu0 }
 0x426   :  { %2247 = vst.msk [vmem:[%s4217_s5 + $0x158] sm:$0xff] %vm2203_vm0, %v2670_v13 }
 0x427   :  { %v2111_v1 = vpop.f32.mrf.mxu0 }
 0x428   :  { %2245 = vst.msk [vmem:[%s4217_s5 + $0x148] sm:$0xff] %vm2203_vm0, %v2111_v1 }
 0x429   :  { %v2673_v25 = vpop.f32.mrf.mxu0 }
 0x42a   :  { %2250 = vst.msk [vmem:[%s4217_s5 + $0x170] sm:$0xff] %vm2203_vm0, %v2673_v25 }
 0x42b   :  { %v2124_v5 = vpop.f32.mrf.mxu0 }
 0x42c   :  { %2248 = vst.msk [vmem:[%s4217_s5 + $0x160] sm:$0xff] %vm2203_vm0, %v2124_v5 }
 0x42d   :  { %v2674_v47 = vpop.f32.mrf.mxu0 }
 0x42e   :  { %2251 = vst.msk [vmem:[%s4217_s5 + $0x178] sm:$0xff] %vm2203_vm0, %v2674_v47 }
 0x42f   :  { %v2127_v37 = vpop.f32.mrf.mxu0 }
 0x430   :  { %2249 = vst.msk [vmem:[%s4217_s5 + $0x168] sm:$0xff] %vm2203_vm0, %v2127_v37 }
 0x431   :  { %v2677_v11 = vpop.f32.mrf.mxu0 }
 0x432   :  { %2254 = vst.msk [vmem:[%s4217_s5 + $0x190] sm:$0xff] %vm2203_vm0, %v2677_v11 }
 0x433   :  { %v2140_v57 = vpop.f32.mrf.mxu0 }
 0x434   :  { %2252 = vst.msk [vmem:[%s4217_s5 + $0x180] sm:$0xff] %vm2203_vm0, %v2140_v57 }
 0x435   :  { %v2678_v15 = vpop.f32.mrf.mxu0 }
 0x436   :  { %2255 = vst.msk [vmem:[%s4217_s5 + $0x198] sm:$0xff] %vm2203_vm0, %v2678_v15 }
 0x437   :  { %v2143_v30 = vpop.f32.mrf.mxu0 }
 0x438   :  { %2253 = vst.msk [vmem:[%s4217_s5 + $0x188] sm:$0xff] %vm2203_vm0, %v2143_v30 }
 0x439   :  { %v2681_v19 = vpop.f32.mrf.mxu0 }
 0x43a   :  { %2258 = vst.msk [vmem:[%s4217_s5 + $0x1b0] sm:$0xff] %vm2203_vm0, %v2681_v19 }
 0x43b   :  { %v2156_v38 = vpop.f32.mrf.mxu0 }
 0x43c   :  { %2256 = vst.msk [vmem:[%s4217_s5 + $0x1a0] sm:$0xff] %vm2203_vm0, %v2156_v38 }
 0x43d   :  { %v2682_v44 = vpop.f32.mrf.mxu0 }
 0x43e   :  { %2259 = vst.msk [vmem:[%s4217_s5 + $0x1b8] sm:$0xff] %vm2203_vm0, %v2682_v44 }
 0x43f   :  { %v2159_v51 = vpop.f32.mrf.mxu0 }
 0x440   :  { %2257 = vst.msk [vmem:[%s4217_s5 + $0x1a8] sm:$0xff] %vm2203_vm0, %v2159_v51 }
 0x441   :  { %v2685_v29 = vpop.f32.mrf.mxu0 }
 0x442   :  { %2262 = vst.msk [vmem:[%s4217_s5 + $0x1d0] sm:$0xff] %vm2203_vm0, %v2685_v29 }
 0x443   :  { %v2172_v7 = vpop.f32.mrf.mxu0 }
 0x444   :  { %2260 = vst.msk [vmem:[%s4217_s5 + $0x1c0] sm:$0xff] %vm2203_vm0, %v2172_v7 }
 0x445   :  { %v2686_v55 = vpop.f32.mrf.mxu0 }
 0x446   :  { %2263 = vst.msk [vmem:[%s4217_s5 + $0x1d8] sm:$0xff] %vm2203_vm0, %v2686_v55 }
 0x447   :  { %v2175_v52 = vpop.f32.mrf.mxu0 }
 0x448   :  { %2261 = vst.msk [vmem:[%s4217_s5 + $0x1c8] sm:$0xff] %vm2203_vm0, %v2175_v52 }
 0x485   :  { %v2689_v45 = vpop.f32.mrf.mxu0 }
 0x486   :  { %2266 = vst.msk [vmem:[%s4217_s5 + $0x1f0] sm:$0xff] %vm2203_vm0, %v2689_v45 }
 0x487   :  { %v2188_v49 = vpop.f32.mrf.mxu0 }
 0x488   :  { %2264 = vst.msk [vmem:[%s4217_s5 + $0x1e0] sm:$0xff] %vm2203_vm0, %v2188_v49 }
 0x489   :  { %v2690_v0 = vpop.f32.mrf.mxu0 }
 0x48a   :  { %2267 = vst.msk [vmem:[%s4217_s5 + $0x1f8] sm:$0xff] %vm2203_vm0, %v2690_v0 }
 0x48b   :  { %v2191_v62 = vpop.f32.mrf.mxu0 }
 0x48c   :  { %2265 = vst.msk [vmem:[%s4217_s5 + $0x1e8] sm:$0xff] %vm2203_vm0, %v2191_v62 }
 0x48d   :  { %2272 = vsyncpa [#allocation3], 1 }
 0x48e   :  { %2273 = vsyncpa [#allocation5], 1 }

</bundles_post_ra>
